<compile_context>
chip_gen: v5e
topology: v5e:2x2
jax: 0.10.0
libtpu: 0.0.40
codegen_flags: <defaults>
</compile_context>

<pallas_src>
import math

import jax
import jax.numpy as jnp
from jax.experimental import pallas as pl
from jax.experimental.pallas import tpu as pltpu

LATENT_DIM = 12
HIDDEN = 12            # LSTM hidden size per direction
NGATES = 4
GOFF = 32              # per-gate lane offset inside the single 128-lane block
SLAB_W = 128           # slab lane width (one vreg lane span)

# Packed-weight-slab row offsets (all 8-sublane aligned).
ROW_WHH = 0            # rows  0..11 : W_hh fwd (H, 128), gate-packed, g x2
ROW_WEMB = 16          # rows 16..39 : [wemb_fwd ; wemb_bwd] stacked, cols 0..L-1
ROW_WHEAD = 40         # rows 40..51 : fused head [wmn | wsd], cols 0..2L-1
ROW_WIH_F = 56         # row 56      : W_ih fwd (1, 128), gate-packed, g x2
ROW_B_F = 64           # row 64      : b_ih+b_hh fwd, gate-packed, g x2
ROW_WIH_B = 72         # row 72      : W_ih bwd
ROW_B_B = 80           # row 80      : b_ih+b_hh bwd
ROW_BEMB = 88          # row 88      : bemb, cols 0..L-1
ROW_BHEAD = 96         # row 96      : [bmn | bsd], cols 0..2L-1
SLAB_R = 104           # 104 x 128 x 4 B = 52 KiB (was 176 KiB)


def _round_up(a, m):
    return (a + m - 1) // m * m


def encoder_kernel(x_ref, eps_ref, w_ref, out_ref, head_ref):
    B, T = x_ref.shape
    H = HIDDEN
    L = LATENT_DIM

    x = x_ref[...]                                        # (B, T)

    # --- static, 8-row-aligned views into the single packed weight slab ---
    whh_f = w_ref[ROW_WHH:ROW_WHH + H, :]                 # (H, 128) gate-packed
    wih_f = w_ref[ROW_WIH_F:ROW_WIH_F + 1, :]             # (1, 128)
    b_f = w_ref[ROW_B_F:ROW_B_F + 1, :]
    wih_b = w_ref[ROW_WIH_B:ROW_WIH_B + 1, :]
    b_b = w_ref[ROW_B_B:ROW_B_B + 1, :]

    def half_cell(gates, c):
        """(B,128) gates -> (h_new, c_new); 2 EUP launches per step.

        All four gates live in one 128-lane block (i/f/g/o at lane offsets
        0/32/64/96); the g-gate pre-activation was pre-scaled by 2 in the
        packed weights, so a SINGLE sigmoid covers every gate and
        tanh(g) = 2*sigmoid(2g) - 1.  Gate realignment uses pltpu.roll (XLU,
        otherwise idle).  Only lanes 0..H-1 of h/c are meaningful; the other
        lanes carry bounded junk (sigmoid outputs, |c| <= T) that is masked
        off after the recurrence.
        """
        s = jax.nn.sigmoid(gates)                         # wide EUP launch #1
        i = s                                             # i gate @ lanes 0..H-1
        f = pltpu.roll(s, SLAB_W - 1 * GOFF, 1)           # f -> lanes 0..H-1
        g = 2.0 * pltpu.roll(s, SLAB_W - 2 * GOFF, 1) - 1.0   # tanh(g_pre)
        o = pltpu.roll(s, SLAB_W - 3 * GOFF, 1)           # o -> lanes 0..H-1
        c_new = f * c + i * g
        tanh_c = 2.0 * jax.nn.sigmoid(2.0 * c_new) - 1.0  # EUP launch #2
        return o * tanh_c, c_new

    # --- forward-direction LSTM, statically unrolled (T is small); only h/c
    # are carried so live vreg state stays tiny (no hoisted per-step buffer).
    # TODO(synk): for long sequences switch to lax.fori_loop(unroll=True) to
    # bound compile time.
    h = jnp.zeros((B, SLAB_W), jnp.float32)
    c = jnp.zeros((B, SLAB_W), jnp.float32)
    for t in range(T):
        # Input-gate term computed inline: cheap VPU work that co-issues with
        # the MXU/EUP critical path.
        gates = (x[:, t:t + 1] * wih_f + b_f
                 + jnp.dot(h[:, 0:H], whh_f, preferred_element_type=jnp.float32))
        h, c = half_cell(gates, c)

    # --- backward direction: the bidirectional output at the LAST time step is
    # the reverse scan's FIRST step (reference reads output[:, -1, :], not h_n),
    # i.e. one cell on x[:, T-1] from the all-zero initial state (PyTorch
    # default).  h0 = 0, so there is no h @ W_hh_bwd term and W_hh_bwd is not
    # even stored in the slab. ---
    h_b, _ = half_cell(x[:, T - 1:T] * wih_b + b_b,
                       jnp.zeros((B, SLAB_W), jnp.float32))

    # --- dense tail ---
    # Mask the junk lanes once, then fuse the two embedding matmuls into one:
    # feat = [h_fwd | h_bwd | 0...] against the stacked (2H, 128) weight block.
    lane = jax.lax.broadcasted_iota(jnp.int32, (B, SLAB_W), 1)
    h_fwd_m = jnp.where(lane < H, h, 0.0)                 # clean fwd h
    h_bwd_m = jnp.where(lane < H, h_b, 0.0)               # clean bwd h
    feat = h_fwd_m + pltpu.roll(h_bwd_m, H, 1)            # h_bwd -> lanes H..2H-1

    w_emb = w_ref[ROW_WEMB:ROW_WEMB + 2 * H, :]           # (2H, 128), cols 0..L-1
    b_emb = w_ref[ROW_BEMB:ROW_BEMB + 1, :]
    w_hd = w_ref[ROW_WHEAD:ROW_WHEAD + H, :]              # mn @ cols 0..L-1, sd @ L..2L-1
    b_hd = w_ref[ROW_BHEAD:ROW_BHEAD + 1, :]

    emb = jnp.dot(feat[:, 0:2 * H], w_emb,
                  preferred_element_type=jnp.float32) + b_emb
    emb = jnp.maximum(emb, 0.0)                           # (B, 128); lanes >= L are 0

    head = (jnp.dot(emb[:, 0:L], w_hd, preferred_element_type=jnp.float32)
            + b_hd)                                       # mn @ 0..L-1, sd @ L..2L-1, 0 beyond

    # Reparameterization on narrow (B, L) values; eps arrives un-padded (B, L).
    mn = head[:, 0:L]
    sd = pltpu.roll(head, SLAB_W - L, 1)[:, 0:L]          # sd -> lanes 0..L-1 (XLU)
    std = jnp.exp(0.5 * sd)                               # exp only on real sd lanes
    out = eps_ref[...] * std + mn

    # Two narrow, lane-dense stores: out (B, L) and [mn | sd] (B, 2L).
    out_ref[...] = out
    head_ref[...] = head[:, 0:2 * L]


def init_params(key):
    """Deterministic init matching the PyTorch layer shapes (weights stored
    transposed; LSTM biases b_ih + b_hh pre-summed). Gate order: i, f, g, o."""
    H, L = HIDDEN, LATENT_DIM
    ks = jax.random.split(key, 16)

    def u(k, shape, bound):
        return jax.random.uniform(k, shape, jnp.float32, -bound, bound)

    kh = 1.0 / math.sqrt(H)        # LSTM init bound
    k24 = 1.0 / math.sqrt(2 * H)   # Linear(24, L) init bound
    k12 = 1.0 / math.sqrt(L)       # Linear(L, L) init bound

    return dict(
        # forward direction LSTM
        wih_f=u(ks[0], (1, 4 * H), kh),            # weight_ih_l0.T
        whh_f=u(ks[1], (H, 4 * H), kh),            # weight_hh_l0.T
        b_f=u(ks[2], (1, 4 * H), kh) + u(ks[3], (1, 4 * H), kh),
        # reverse direction LSTM
        wih_b=u(ks[4], (1, 4 * H), kh),
        whh_b=u(ks[5], (H, 4 * H), kh),            # unused by the kernel (h0 = 0)
        b_b=u(ks[6], (1, 4 * H), kh) + u(ks[7], (1, 4 * H), kh),
        # embedding Linear(24, L)
        wemb=u(ks[8], (2 * H, L), k24),
        bemb=u(ks[9], (1, L), k24),
        # mn / sd Linear(L, L)
        wmn=u(ks[10], (L, L), k12),
        bmn=u(ks[11], (1, L), k12),
        wsd=u(ks[12], (L, L), k12),
        bsd=u(ks[13], (1, L), k12),
    )


def pack_params(p):
    """Pack all weights/biases into one lane-padded (104, 128) f32 slab.

    The four LSTM gates are packed into a SINGLE 128-lane block at lane
    offsets 0/32/64/96 and the g-gate columns are pre-scaled by 2 (so one
    sigmoid covers all gates in the kernel).  W_hh_bwd is intentionally not
    stored (the backward direction runs a single cell from the zero state).
    """
    H, L = HIDDEN, LATENT_DIM

    def gate_pack(m):                                   # (rows, 4H) -> (rows, 128)
        rows = m.shape[0]
        out = jnp.zeros((rows, SLAB_W), jnp.float32)
        for k in range(NGATES):
            blk = m[:, k * H:(k + 1) * H]
            if k == 2:                                  # g gate: tanh via sigmoid trick
                blk = blk * 2.0
            out = out.at[:, k * GOFF:k * GOFF + H].set(blk)
        return out

    wemb_stack = jnp.zeros((2 * H, SLAB_W), jnp.float32).at[:, 0:L].set(p["wemb"])
    w_head = (jnp.zeros((H, SLAB_W), jnp.float32)
              .at[:, 0:L].set(p["wmn"])
              .at[:, L:2 * L].set(p["wsd"]))

    slab = jnp.zeros((SLAB_R, SLAB_W), jnp.float32)
    slab = slab.at[ROW_WHH:ROW_WHH + H].set(gate_pack(p["whh_f"]))
    slab = slab.at[ROW_WEMB:ROW_WEMB + 2 * H].set(wemb_stack)
    slab = slab.at[ROW_WHEAD:ROW_WHEAD + H].set(w_head)
    slab = slab.at[ROW_WIH_F:ROW_WIH_F + 1].set(gate_pack(p["wih_f"]))
    slab = slab.at[ROW_B_F:ROW_B_F + 1].set(gate_pack(p["b_f"]))
    slab = slab.at[ROW_WIH_B:ROW_WIH_B + 1].set(gate_pack(p["wih_b"]))
    slab = slab.at[ROW_B_B:ROW_B_B + 1].set(gate_pack(p["b_b"]))
    slab = slab.at[ROW_BEMB, 0:L].set(p["bemb"][0])
    slab = slab.at[ROW_BHEAD, 0:L].set(p["bmn"][0])
    slab = slab.at[ROW_BHEAD, L:2 * L].set(p["bsd"][0])
    return slab


def encoder_forward(x, params, eps, *, b_tile=None):
    """x: (B, T, 1) f32;  eps: (B, latent) f32 N(0,1) noise.  Returns (out, mn, sd)."""
    B, T, F = x.shape
    assert F == 1
    L = LATENT_DIM

    if b_tile is None:
        b8 = _round_up(max(B, 1), 8)
        if b8 <= 16:
            b_tile = b8                        # tiny batch: one right-sized tile
        else:
            # Right-size the tile AND split into >= 2 batch blocks so v7x's two
            # TensorCores both get work (neutral on single-TC v5e/v6e); per-tile
            # VMEM stays << limits on every generation.
            # TODO(synk): sweep the 128 cap in {128, 256, 512} for very large B.
            b_tile = min(128, _round_up(pl.cdiv(b8, 2), 8))
    b_pad = pl.cdiv(B, b_tile) * b_tile
    n_blocks = b_pad // b_tile

    x_pad = jnp.zeros((b_pad, T), jnp.float32).at[:B, :].set(x[:, :, 0])
    eps_pad = jnp.zeros((b_pad, L), jnp.float32).at[:B, :].set(eps)   # un-padded lanes
    slab = pack_params(params)

    out, head = pl.pallas_call(
        encoder_kernel,
        out_shape=(jax.ShapeDtypeStruct((b_pad, L), jnp.float32),
                   jax.ShapeDtypeStruct((b_pad, 2 * L), jnp.float32)),
        grid=(n_blocks,),
        in_specs=[
            pl.BlockSpec((b_tile, T), lambda i: (i, 0)),
            pl.BlockSpec((b_tile, L), lambda i: (i, 0)),
            pl.BlockSpec((SLAB_R, SLAB_W), lambda i: (0, 0)),
        ],
        out_specs=[
            pl.BlockSpec((b_tile, L), lambda i: (i, 0)),
            pl.BlockSpec((b_tile, 2 * L), lambda i: (i, 0)),
        ],
        compiler_params=pltpu.CompilerParams(
            dimension_semantics=("parallel",)),   # v7x: both TCs split batch blocks
    )(x_pad, eps_pad, slab)

    return out[:B], head[:B, 0:L], head[:B, L:2 * L]


def encoder_reference(x, p, eps):
    """Pure-JAX reference (direct tanh/sigmoid, unpacked weights)."""
    H = HIDDEN
    B, T, _ = x.shape
    xs = x[:, :, 0]

    def cell(x_t, h, c, wih_t, whh_t, b):
        gates = x_t * wih_t + jnp.dot(h, whh_t) + b
        i = jax.nn.sigmoid(gates[:, 0 * H:1 * H])
        f = jax.nn.sigmoid(gates[:, 1 * H:2 * H])
        g = jnp.tanh(gates[:, 2 * H:3 * H])
        o = jax.nn.sigmoid(gates[:, 3 * H:4 * H])
        c = f * c + i * g
        return o * jnp.tanh(c), c

    h = jnp.zeros((B, H), jnp.float32)
    c = jnp.zeros((B, H), jnp.float32)
    for t in range(T):
        h, c = cell(xs[:, t:t + 1], h, c, p["wih_f"], p["whh_f"], p["b_f"])
    h_bwd, _ = cell(xs[:, T - 1:T], jnp.zeros((B, H), jnp.float32),
                    jnp.zeros((B, H), jnp.float32),
                    p["wih_b"], p["whh_b"], p["b_b"])
    feat = jnp.concatenate([h, h_bwd], axis=1)
    emb = jax.nn.relu(jnp.dot(feat, p["wemb"]) + p["bemb"])
    mn = jnp.dot(emb, p["wmn"]) + p["bmn"]
    sd = jnp.dot(emb, p["wsd"]) + p["bsd"]
    out = eps * jnp.exp(0.5 * sd) + mn
    return out, mn, sd


if __name__ == "__main__":
    key = jax.random.PRNGKey(0)
    k_param, k_x, k_eps, k_x2, k_eps2 = jax.random.split(key, 5)

    params = init_params(k_param)

    # Small shape matching the module: batch=2, seq=8, feature=1.
    B, T = 2, 8
    x = jax.random.normal(k_x, (B, T, 1), jnp.float32)
    # TODO(synk): PyTorch draws eps with torch.normal inside forward(); here the
    # N(0,1) noise is drawn with JAX's RNG and passed into the kernel.
    eps = jax.random.normal(k_eps, (B, LATENT_DIM), jnp.float32)

    out, mn, sd = encoder_forward(x, params, eps)
    jax.block_until_ready((out, mn, sd))

    assert out.shape == (B, LATENT_DIM)
    assert mn.shape == (B, LATENT_DIM)
    assert sd.shape == (B, LATENT_DIM)

    out_r, mn_r, sd_r = encoder_reference(x, params, eps)
    assert jnp.allclose(mn, mn_r, atol=1e-3, rtol=1e-3)
    assert jnp.allclose(sd, sd_r, atol=1e-3, rtol=1e-3)
    assert jnp.allclose(out, out_r, atol=1e-3, rtol=1e-3)

    # Multi-block path: B=40 -> b_tile=24, grid=2 (exercises the right-sized
    # tile heuristic and the v7x megacore split; still tiny).
    B2 = 40
    x2 = jax.random.normal(k_x2, (B2, T, 1), jnp.float32)
    eps2 = jax.random.normal(k_eps2, (B2, LATENT_DIM), jnp.float32)
    out2, mn2, sd2 = encoder_forward(x2, params, eps2)
    jax.block_until_ready((out2, mn2, sd2))
    out2_r, mn2_r, sd2_r = encoder_reference(x2, params, eps2)
    assert jnp.allclose(mn2, mn2_r, atol=1e-3, rtol=1e-3)
    assert jnp.allclose(sd2, sd2_r, atol=1e-3, rtol=1e-3)
    assert jnp.allclose(out2, out2_r, atol=1e-3, rtol=1e-3)

    print("KERNEL_OK")
</pallas_src>

<mosaic_0001>
module attributes {stable_mosaic.version = 11 : i64} {
  func.func @encoder_kernel(%arg0: i32, %arg1: memref<8x8xf32, #tpu.memory_space<vmem>>, %arg2: memref<8x12xf32, #tpu.memory_space<vmem>>, %arg3: memref<104x128xf32, #tpu.memory_space<vmem>>, %arg4: memref<8x12xf32, #tpu.memory_space<vmem>>, %arg5: memref<8x24xf32, #tpu.memory_space<vmem>>) attributes {dimension_semantics = [#tpu.dimension_semantics<parallel>], iteration_bounds = array<i64: 1>, scalar_prefetch = 0 : i64, scratch_operands = 0 : i64, tpu.core_type = #tpu.core_type<tc>, window_params = [{transform_indices = @transform_0, window_bounds = array<i64: 8, 8>}, {transform_indices = @transform_1, window_bounds = array<i64: 8, 12>}, {pipeline_mode = #tpu.pipeline_mode<synchronous>, transform_indices = @transform_2, window_bounds = array<i64: 104, 128>}, {transform_indices = @transform_3, window_bounds = array<i64: 8, 12>}, {transform_indices = @transform_4, window_bounds = array<i64: 8, 24>}]} {
    %c0 = arith.constant 0 : index
    %c0_0 = arith.constant 0 : index
    %0 = vector.load %arg1[%c0, %c0_0] : memref<8x8xf32, #tpu.memory_space<vmem>>, vector<8x8xf32>
    %c0_1 = arith.constant 0 : index
    %c0_2 = arith.constant 0 : index
    %1 = vector.load %arg3[%c0_1, %c0_2] : memref<104x128xf32, #tpu.memory_space<vmem>>, vector<12x128xf32>
    %c56 = arith.constant 56 : index
    %c0_3 = arith.constant 0 : index
    %2 = vector.load %arg3[%c56, %c0_3] : memref<104x128xf32, #tpu.memory_space<vmem>>, vector<1x128xf32>
    %c64 = arith.constant 64 : index
    %c0_4 = arith.constant 0 : index
    %3 = vector.load %arg3[%c64, %c0_4] : memref<104x128xf32, #tpu.memory_space<vmem>>, vector<1x128xf32>
    %c72 = arith.constant 72 : index
    %c0_5 = arith.constant 0 : index
    %4 = vector.load %arg3[%c72, %c0_5] : memref<104x128xf32, #tpu.memory_space<vmem>>, vector<1x128xf32>
    %c80 = arith.constant 80 : index
    %c0_6 = arith.constant 0 : index
    %5 = vector.load %arg3[%c80, %c0_6] : memref<104x128xf32, #tpu.memory_space<vmem>>, vector<1x128xf32>
    %cst = arith.constant 0.000000e+00 : f32
    %6 = vector.broadcast %cst : f32 to vector<8x128xf32>
    %cst_7 = arith.constant 0.000000e+00 : f32
    %7 = vector.broadcast %cst_7 : f32 to vector<8x128xf32>
    %8 = vector.extract_strided_slice %0 {offsets = [0, 0], sizes = [8, 1], strides = [1, 1]} : vector<8x8xf32> to vector<8x1xf32>
    %9 = vector.broadcast %8 : vector<8x1xf32> to vector<8x128xf32>
    %10 = vector.broadcast %2 : vector<1x128xf32> to vector<8x128xf32>
    %11 = arith.mulf %9, %10 : vector<8x128xf32>
    %12 = vector.broadcast %3 : vector<1x128xf32> to vector<8x128xf32>
    %13 = arith.addf %11, %12 : vector<8x128xf32>
    %14 = vector.extract_strided_slice %6 {offsets = [0, 0], sizes = [8, 12], strides = [1, 1]} : vector<8x128xf32> to vector<8x12xf32>
    %cst_8 = arith.constant dense<0.000000e+00> : vector<8x128xf32>
    %15 = tpu.matmul %14, %1, %cst_8 {dimension_numbers = #tpu.dot_dimension_numbers<[1], [0], [0], [1], [0, 0, 1, 1], [], []>} : vector<8x12xf32>, vector<12x128xf32>, vector<8x128xf32> -> vector<8x128xf32>
    %16 = arith.addf %13, %15 : vector<8x128xf32>
    %17 = arith.negf %16 : vector<8x128xf32>
    %18 = math.exp %17 : vector<8x128xf32>
    %cst_9 = arith.constant 1.000000e+00 : f32
    %19 = vector.broadcast %cst_9 : f32 to vector<8x128xf32>
    %20 = arith.addf %19, %18 : vector<8x128xf32>
    %21 = arith.divf %19, %20 : vector<8x128xf32>
    %c96_i32 = arith.constant 96 : i32
    %22 = tpu.dynamic_rotate %21 by %c96_i32 dim 1 : vector<8x128xf32>, i32 -> vector<8x128xf32>
    %c64_i32 = arith.constant 64 : i32
    %23 = tpu.dynamic_rotate %21 by %c64_i32 dim 1 : vector<8x128xf32>, i32 -> vector<8x128xf32>
    %cst_10 = arith.constant 2.000000e+00 : f32
    %24 = vector.broadcast %cst_10 : f32 to vector<8x128xf32>
    %25 = arith.mulf %24, %23 : vector<8x128xf32>
    %cst_11 = arith.constant 1.000000e+00 : f32
    %26 = vector.broadcast %cst_11 : f32 to vector<8x128xf32>
    %27 = arith.subf %25, %26 : vector<8x128xf32>
    %c32_i32 = arith.constant 32 : i32
    %28 = tpu.dynamic_rotate %21 by %c32_i32 dim 1 : vector<8x128xf32>, i32 -> vector<8x128xf32>
    %29 = arith.mulf %22, %7 : vector<8x128xf32>
    %30 = arith.mulf %21, %27 : vector<8x128xf32>
    %31 = arith.addf %29, %30 : vector<8x128xf32>
    %cst_12 = arith.constant 2.000000e+00 : f32
    %32 = vector.broadcast %cst_12 : f32 to vector<8x128xf32>
    %33 = arith.mulf %32, %31 : vector<8x128xf32>
    %34 = arith.negf %33 : vector<8x128xf32>
    %35 = math.exp %34 : vector<8x128xf32>
    %cst_13 = arith.constant 1.000000e+00 : f32
    %36 = vector.broadcast %cst_13 : f32 to vector<8x128xf32>
    %37 = arith.addf %36, %35 : vector<8x128xf32>
    %38 = arith.divf %36, %37 : vector<8x128xf32>
    %cst_14 = arith.constant 2.000000e+00 : f32
    %39 = vector.broadcast %cst_14 : f32 to vector<8x128xf32>
    %40 = arith.mulf %39, %38 : vector<8x128xf32>
    %cst_15 = arith.constant 1.000000e+00 : f32
    %41 = vector.broadcast %cst_15 : f32 to vector<8x128xf32>
    %42 = arith.subf %40, %41 : vector<8x128xf32>
    %43 = arith.mulf %28, %42 : vector<8x128xf32>
    %44 = vector.extract_strided_slice %0 {offsets = [0, 1], sizes = [8, 1], strides = [1, 1]} : vector<8x8xf32> to vector<8x1xf32>
    %45 = vector.broadcast %44 : vector<8x1xf32> to vector<8x128xf32>
    %46 = vector.broadcast %2 : vector<1x128xf32> to vector<8x128xf32>
    %47 = arith.mulf %45, %46 : vector<8x128xf32>
    %48 = vector.broadcast %3 : vector<1x128xf32> to vector<8x128xf32>
    %49 = arith.addf %47, %48 : vector<8x128xf32>
    %50 = vector.extract_strided_slice %43 {offsets = [0, 0], sizes = [8, 12], strides = [1, 1]} : vector<8x128xf32> to vector<8x12xf32>
    %cst_16 = arith.constant dense<0.000000e+00> : vector<8x128xf32>
    %51 = tpu.matmul %50, %1, %cst_16 {dimension_numbers = #tpu.dot_dimension_numbers<[1], [0], [0], [1], [0, 0, 1, 1], [], []>} : vector<8x12xf32>, vector<12x128xf32>, vector<8x128xf32> -> vector<8x128xf32>
    %52 = arith.addf %49, %51 : vector<8x128xf32>
    %53 = arith.negf %52 : vector<8x128xf32>
    %54 = math.exp %53 : vector<8x128xf32>
    %cst_17 = arith.constant 1.000000e+00 : f32
    %55 = vector.broadcast %cst_17 : f32 to vector<8x128xf32>
    %56 = arith.addf %55, %54 : vector<8x128xf32>
    %57 = arith.divf %55, %56 : vector<8x128xf32>
    %c96_i32_18 = arith.constant 96 : i32
    %58 = tpu.dynamic_rotate %57 by %c96_i32_18 dim 1 : vector<8x128xf32>, i32 -> vector<8x128xf32>
    %c64_i32_19 = arith.constant 64 : i32
    %59 = tpu.dynamic_rotate %57 by %c64_i32_19 dim 1 : vector<8x128xf32>, i32 -> vector<8x128xf32>
    %cst_20 = arith.constant 2.000000e+00 : f32
    %60 = vector.broadcast %cst_20 : f32 to vector<8x128xf32>
    %61 = arith.mulf %60, %59 : vector<8x128xf32>
    %cst_21 = arith.constant 1.000000e+00 : f32
    %62 = vector.broadcast %cst_21 : f32 to vector<8x128xf32>
    %63 = arith.subf %61, %62 : vector<8x128xf32>
    %c32_i32_22 = arith.constant 32 : i32
    %64 = tpu.dynamic_rotate %57 by %c32_i32_22 dim 1 : vector<8x128xf32>, i32 -> vector<8x128xf32>
    %65 = arith.mulf %58, %31 : vector<8x128xf32>
    %66 = arith.mulf %57, %63 : vector<8x128xf32>
    %67 = arith.addf %65, %66 : vector<8x128xf32>
    %cst_23 = arith.constant 2.000000e+00 : f32
    %68 = vector.broadcast %cst_23 : f32 to vector<8x128xf32>
    %69 = arith.mulf %68, %67 : vector<8x128xf32>
    %70 = arith.negf %69 : vector<8x128xf32>
    %71 = math.exp %70 : vector<8x128xf32>
    %cst_24 = arith.constant 1.000000e+00 : f32
    %72 = vector.broadcast %cst_24 : f32 to vector<8x128xf32>
    %73 = arith.addf %72, %71 : vector<8x128xf32>
    %74 = arith.divf %72, %73 : vector<8x128xf32>
    %cst_25 = arith.constant 2.000000e+00 : f32
    %75 = vector.broadcast %cst_25 : f32 to vector<8x128xf32>
    %76 = arith.mulf %75, %74 : vector<8x128xf32>
    %cst_26 = arith.constant 1.000000e+00 : f32
    %77 = vector.broadcast %cst_26 : f32 to vector<8x128xf32>
    %78 = arith.subf %76, %77 : vector<8x128xf32>
    %79 = arith.mulf %64, %78 : vector<8x128xf32>
    %80 = vector.extract_strided_slice %0 {offsets = [0, 2], sizes = [8, 1], strides = [1, 1]} : vector<8x8xf32> to vector<8x1xf32>
    %81 = vector.broadcast %80 : vector<8x1xf32> to vector<8x128xf32>
    %82 = vector.broadcast %2 : vector<1x128xf32> to vector<8x128xf32>
    %83 = arith.mulf %81, %82 : vector<8x128xf32>
    %84 = vector.broadcast %3 : vector<1x128xf32> to vector<8x128xf32>
    %85 = arith.addf %83, %84 : vector<8x128xf32>
    %86 = vector.extract_strided_slice %79 {offsets = [0, 0], sizes = [8, 12], strides = [1, 1]} : vector<8x128xf32> to vector<8x12xf32>
    %cst_27 = arith.constant dense<0.000000e+00> : vector<8x128xf32>
    %87 = tpu.matmul %86, %1, %cst_27 {dimension_numbers = #tpu.dot_dimension_numbers<[1], [0], [0], [1], [0, 0, 1, 1], [], []>} : vector<8x12xf32>, vector<12x128xf32>, vector<8x128xf32> -> vector<8x128xf32>
    %88 = arith.addf %85, %87 : vector<8x128xf32>
    %89 = arith.negf %88 : vector<8x128xf32>
    %90 = math.exp %89 : vector<8x128xf32>
    %cst_28 = arith.constant 1.000000e+00 : f32
    %91 = vector.broadcast %cst_28 : f32 to vector<8x128xf32>
    %92 = arith.addf %91, %90 : vector<8x128xf32>
    %93 = arith.divf %91, %92 : vector<8x128xf32>
    %c96_i32_29 = arith.constant 96 : i32
    %94 = tpu.dynamic_rotate %93 by %c96_i32_29 dim 1 : vector<8x128xf32>, i32 -> vector<8x128xf32>
    %c64_i32_30 = arith.constant 64 : i32
    %95 = tpu.dynamic_rotate %93 by %c64_i32_30 dim 1 : vector<8x128xf32>, i32 -> vector<8x128xf32>
    %cst_31 = arith.constant 2.000000e+00 : f32
    %96 = vector.broadcast %cst_31 : f32 to vector<8x128xf32>
    %97 = arith.mulf %96, %95 : vector<8x128xf32>
    %cst_32 = arith.constant 1.000000e+00 : f32
    %98 = vector.broadcast %cst_32 : f32 to vector<8x128xf32>
    %99 = arith.subf %97, %98 : vector<8x128xf32>
    %c32_i32_33 = arith.constant 32 : i32
    %100 = tpu.dynamic_rotate %93 by %c32_i32_33 dim 1 : vector<8x128xf32>, i32 -> vector<8x128xf32>
    %101 = arith.mulf %94, %67 : vector<8x128xf32>
    %102 = arith.mulf %93, %99 : vector<8x128xf32>
    %103 = arith.addf %101, %102 : vector<8x128xf32>
    %cst_34 = arith.constant 2.000000e+00 : f32
    %104 = vector.broadcast %cst_34 : f32 to vector<8x128xf32>
    %105 = arith.mulf %104, %103 : vector<8x128xf32>
    %106 = arith.negf %105 : vector<8x128xf32>
    %107 = math.exp %106 : vector<8x128xf32>
    %cst_35 = arith.constant 1.000000e+00 : f32
    %108 = vector.broadcast %cst_35 : f32 to vector<8x128xf32>
    %109 = arith.addf %108, %107 : vector<8x128xf32>
    %110 = arith.divf %108, %109 : vector<8x128xf32>
    %cst_36 = arith.constant 2.000000e+00 : f32
    %111 = vector.broadcast %cst_36 : f32 to vector<8x128xf32>
    %112 = arith.mulf %111, %110 : vector<8x128xf32>
    %cst_37 = arith.constant 1.000000e+00 : f32
    %113 = vector.broadcast %cst_37 : f32 to vector<8x128xf32>
    %114 = arith.subf %112, %113 : vector<8x128xf32>
    %115 = arith.mulf %100, %114 : vector<8x128xf32>
    %116 = vector.extract_strided_slice %0 {offsets = [0, 3], sizes = [8, 1], strides = [1, 1]} : vector<8x8xf32> to vector<8x1xf32>
    %117 = vector.broadcast %116 : vector<8x1xf32> to vector<8x128xf32>
    %118 = vector.broadcast %2 : vector<1x128xf32> to vector<8x128xf32>
    %119 = arith.mulf %117, %118 : vector<8x128xf32>
    %120 = vector.broadcast %3 : vector<1x128xf32> to vector<8x128xf32>
    %121 = arith.addf %119, %120 : vector<8x128xf32>
    %122 = vector.extract_strided_slice %115 {offsets = [0, 0], sizes = [8, 12], strides = [1, 1]} : vector<8x128xf32> to vector<8x12xf32>
    %cst_38 = arith.constant dense<0.000000e+00> : vector<8x128xf32>
    %123 = tpu.matmul %122, %1, %cst_38 {dimension_numbers = #tpu.dot_dimension_numbers<[1], [0], [0], [1], [0, 0, 1, 1], [], []>} : vector<8x12xf32>, vector<12x128xf32>, vector<8x128xf32> -> vector<8x128xf32>
    %124 = arith.addf %121, %123 : vector<8x128xf32>
    %125 = arith.negf %124 : vector<8x128xf32>
    %126 = math.exp %125 : vector<8x128xf32>
    %cst_39 = arith.constant 1.000000e+00 : f32
    %127 = vector.broadcast %cst_39 : f32 to vector<8x128xf32>
    %128 = arith.addf %127, %126 : vector<8x128xf32>
    %129 = arith.divf %127, %128 : vector<8x128xf32>
    %c96_i32_40 = arith.constant 96 : i32
    %130 = tpu.dynamic_rotate %129 by %c96_i32_40 dim 1 : vector<8x128xf32>, i32 -> vector<8x128xf32>
    %c64_i32_41 = arith.constant 64 : i32
    %131 = tpu.dynamic_rotate %129 by %c64_i32_41 dim 1 : vector<8x128xf32>, i32 -> vector<8x128xf32>
    %cst_42 = arith.constant 2.000000e+00 : f32
    %132 = vector.broadcast %cst_42 : f32 to vector<8x128xf32>
    %133 = arith.mulf %132, %131 : vector<8x128xf32>
    %cst_43 = arith.constant 1.000000e+00 : f32
    %134 = vector.broadcast %cst_43 : f32 to vector<8x128xf32>
    %135 = arith.subf %133, %134 : vector<8x128xf32>
    %c32_i32_44 = arith.constant 32 : i32
    %136 = tpu.dynamic_rotate %129 by %c32_i32_44 dim 1 : vector<8x128xf32>, i32 -> vector<8x128xf32>
    %137 = arith.mulf %130, %103 : vector<8x128xf32>
    %138 = arith.mulf %129, %135 : vector<8x128xf32>
    %139 = arith.addf %137, %138 : vector<8x128xf32>
    %cst_45 = arith.constant 2.000000e+00 : f32
    %140 = vector.broadcast %cst_45 : f32 to vector<8x128xf32>
    %141 = arith.mulf %140, %139 : vector<8x128xf32>
    %142 = arith.negf %141 : vector<8x128xf32>
    %143 = math.exp %142 : vector<8x128xf32>
    %cst_46 = arith.constant 1.000000e+00 : f32
    %144 = vector.broadcast %cst_46 : f32 to vector<8x128xf32>
    %145 = arith.addf %144, %143 : vector<8x128xf32>
    %146 = arith.divf %144, %145 : vector<8x128xf32>
    %cst_47 = arith.constant 2.000000e+00 : f32
    %147 = vector.broadcast %cst_47 : f32 to vector<8x128xf32>
    %148 = arith.mulf %147, %146 : vector<8x128xf32>
    %cst_48 = arith.constant 1.000000e+00 : f32
    %149 = vector.broadcast %cst_48 : f32 to vector<8x128xf32>
    %150 = arith.subf %148, %149 : vector<8x128xf32>
    %151 = arith.mulf %136, %150 : vector<8x128xf32>
    %152 = vector.extract_strided_slice %0 {offsets = [0, 4], sizes = [8, 1], strides = [1, 1]} : vector<8x8xf32> to vector<8x1xf32>
    %153 = vector.broadcast %152 : vector<8x1xf32> to vector<8x128xf32>
    %154 = vector.broadcast %2 : vector<1x128xf32> to vector<8x128xf32>
    %155 = arith.mulf %153, %154 : vector<8x128xf32>
    %156 = vector.broadcast %3 : vector<1x128xf32> to vector<8x128xf32>
    %157 = arith.addf %155, %156 : vector<8x128xf32>
    %158 = vector.extract_strided_slice %151 {offsets = [0, 0], sizes = [8, 12], strides = [1, 1]} : vector<8x128xf32> to vector<8x12xf32>
    %cst_49 = arith.constant dense<0.000000e+00> : vector<8x128xf32>
    %159 = tpu.matmul %158, %1, %cst_49 {dimension_numbers = #tpu.dot_dimension_numbers<[1], [0], [0], [1], [0, 0, 1, 1], [], []>} : vector<8x12xf32>, vector<12x128xf32>, vector<8x128xf32> -> vector<8x128xf32>
    %160 = arith.addf %157, %159 : vector<8x128xf32>
    %161 = arith.negf %160 : vector<8x128xf32>
    %162 = math.exp %161 : vector<8x128xf32>
    %cst_50 = arith.constant 1.000000e+00 : f32
    %163 = vector.broadcast %cst_50 : f32 to vector<8x128xf32>
    %164 = arith.addf %163, %162 : vector<8x128xf32>
    %165 = arith.divf %163, %164 : vector<8x128xf32>
    %c96_i32_51 = arith.constant 96 : i32
    %166 = tpu.dynamic_rotate %165 by %c96_i32_51 dim 1 : vector<8x128xf32>, i32 -> vector<8x128xf32>
    %c64_i32_52 = arith.constant 64 : i32
    %167 = tpu.dynamic_rotate %165 by %c64_i32_52 dim 1 : vector<8x128xf32>, i32 -> vector<8x128xf32>
    %cst_53 = arith.constant 2.000000e+00 : f32
    %168 = vector.broadcast %cst_53 : f32 to vector<8x128xf32>
    %169 = arith.mulf %168, %167 : vector<8x128xf32>
    %cst_54 = arith.constant 1.000000e+00 : f32
    %170 = vector.broadcast %cst_54 : f32 to vector<8x128xf32>
    %171 = arith.subf %169, %170 : vector<8x128xf32>
    %c32_i32_55 = arith.constant 32 : i32
    %172 = tpu.dynamic_rotate %165 by %c32_i32_55 dim 1 : vector<8x128xf32>, i32 -> vector<8x128xf32>
    %173 = arith.mulf %166, %139 : vector<8x128xf32>
    %174 = arith.mulf %165, %171 : vector<8x128xf32>
    %175 = arith.addf %173, %174 : vector<8x128xf32>
    %cst_56 = arith.constant 2.000000e+00 : f32
    %176 = vector.broadcast %cst_56 : f32 to vector<8x128xf32>
    %177 = arith.mulf %176, %175 : vector<8x128xf32>
    %178 = arith.negf %177 : vector<8x128xf32>
    %179 = math.exp %178 : vector<8x128xf32>
    %cst_57 = arith.constant 1.000000e+00 : f32
    %180 = vector.broadcast %cst_57 : f32 to vector<8x128xf32>
    %181 = arith.addf %180, %179 : vector<8x128xf32>
    %182 = arith.divf %180, %181 : vector<8x128xf32>
    %cst_58 = arith.constant 2.000000e+00 : f32
    %183 = vector.broadcast %cst_58 : f32 to vector<8x128xf32>
    %184 = arith.mulf %183, %182 : vector<8x128xf32>
    %cst_59 = arith.constant 1.000000e+00 : f32
    %185 = vector.broadcast %cst_59 : f32 to vector<8x128xf32>
    %186 = arith.subf %184, %185 : vector<8x128xf32>
    %187 = arith.mulf %172, %186 : vector<8x128xf32>
    %188 = vector.extract_strided_slice %0 {offsets = [0, 5], sizes = [8, 1], strides = [1, 1]} : vector<8x8xf32> to vector<8x1xf32>
    %189 = vector.broadcast %188 : vector<8x1xf32> to vector<8x128xf32>
    %190 = vector.broadcast %2 : vector<1x128xf32> to vector<8x128xf32>
    %191 = arith.mulf %189, %190 : vector<8x128xf32>
    %192 = vector.broadcast %3 : vector<1x128xf32> to vector<8x128xf32>
    %193 = arith.addf %191, %192 : vector<8x128xf32>
    %194 = vector.extract_strided_slice %187 {offsets = [0, 0], sizes = [8, 12], strides = [1, 1]} : vector<8x128xf32> to vector<8x12xf32>
    %cst_60 = arith.constant dense<0.000000e+00> : vector<8x128xf32>
    %195 = tpu.matmul %194, %1, %cst_60 {dimension_numbers = #tpu.dot_dimension_numbers<[1], [0], [0], [1], [0, 0, 1, 1], [], []>} : vector<8x12xf32>, vector<12x128xf32>, vector<8x128xf32> -> vector<8x128xf32>
    %196 = arith.addf %193, %195 : vector<8x128xf32>
    %197 = arith.negf %196 : vector<8x128xf32>
    %198 = math.exp %197 : vector<8x128xf32>
    %cst_61 = arith.constant 1.000000e+00 : f32
    %199 = vector.broadcast %cst_61 : f32 to vector<8x128xf32>
    %200 = arith.addf %199, %198 : vector<8x128xf32>
    %201 = arith.divf %199, %200 : vector<8x128xf32>
    %c96_i32_62 = arith.constant 96 : i32
    %202 = tpu.dynamic_rotate %201 by %c96_i32_62 dim 1 : vector<8x128xf32>, i32 -> vector<8x128xf32>
    %c64_i32_63 = arith.constant 64 : i32
    %203 = tpu.dynamic_rotate %201 by %c64_i32_63 dim 1 : vector<8x128xf32>, i32 -> vector<8x128xf32>
    %cst_64 = arith.constant 2.000000e+00 : f32
    %204 = vector.broadcast %cst_64 : f32 to vector<8x128xf32>
    %205 = arith.mulf %204, %203 : vector<8x128xf32>
    %cst_65 = arith.constant 1.000000e+00 : f32
    %206 = vector.broadcast %cst_65 : f32 to vector<8x128xf32>
    %207 = arith.subf %205, %206 : vector<8x128xf32>
    %c32_i32_66 = arith.constant 32 : i32
    %208 = tpu.dynamic_rotate %201 by %c32_i32_66 dim 1 : vector<8x128xf32>, i32 -> vector<8x128xf32>
    %209 = arith.mulf %202, %175 : vector<8x128xf32>
    %210 = arith.mulf %201, %207 : vector<8x128xf32>
    %211 = arith.addf %209, %210 : vector<8x128xf32>
    %cst_67 = arith.constant 2.000000e+00 : f32
    %212 = vector.broadcast %cst_67 : f32 to vector<8x128xf32>
    %213 = arith.mulf %212, %211 : vector<8x128xf32>
    %214 = arith.negf %213 : vector<8x128xf32>
    %215 = math.exp %214 : vector<8x128xf32>
    %cst_68 = arith.constant 1.000000e+00 : f32
    %216 = vector.broadcast %cst_68 : f32 to vector<8x128xf32>
    %217 = arith.addf %216, %215 : vector<8x128xf32>
    %218 = arith.divf %216, %217 : vector<8x128xf32>
    %cst_69 = arith.constant 2.000000e+00 : f32
    %219 = vector.broadcast %cst_69 : f32 to vector<8x128xf32>
    %220 = arith.mulf %219, %218 : vector<8x128xf32>
    %cst_70 = arith.constant 1.000000e+00 : f32
    %221 = vector.broadcast %cst_70 : f32 to vector<8x128xf32>
    %222 = arith.subf %220, %221 : vector<8x128xf32>
    %223 = arith.mulf %208, %222 : vector<8x128xf32>
    %224 = vector.extract_strided_slice %0 {offsets = [0, 6], sizes = [8, 1], strides = [1, 1]} : vector<8x8xf32> to vector<8x1xf32>
    %225 = vector.broadcast %224 : vector<8x1xf32> to vector<8x128xf32>
    %226 = vector.broadcast %2 : vector<1x128xf32> to vector<8x128xf32>
    %227 = arith.mulf %225, %226 : vector<8x128xf32>
    %228 = vector.broadcast %3 : vector<1x128xf32> to vector<8x128xf32>
    %229 = arith.addf %227, %228 : vector<8x128xf32>
    %230 = vector.extract_strided_slice %223 {offsets = [0, 0], sizes = [8, 12], strides = [1, 1]} : vector<8x128xf32> to vector<8x12xf32>
    %cst_71 = arith.constant dense<0.000000e+00> : vector<8x128xf32>
    %231 = tpu.matmul %230, %1, %cst_71 {dimension_numbers = #tpu.dot_dimension_numbers<[1], [0], [0], [1], [0, 0, 1, 1], [], []>} : vector<8x12xf32>, vector<12x128xf32>, vector<8x128xf32> -> vector<8x128xf32>
    %232 = arith.addf %229, %231 : vector<8x128xf32>
    %233 = arith.negf %232 : vector<8x128xf32>
    %234 = math.exp %233 : vector<8x128xf32>
    %cst_72 = arith.constant 1.000000e+00 : f32
    %235 = vector.broadcast %cst_72 : f32 to vector<8x128xf32>
    %236 = arith.addf %235, %234 : vector<8x128xf32>
    %237 = arith.divf %235, %236 : vector<8x128xf32>
    %c96_i32_73 = arith.constant 96 : i32
    %238 = tpu.dynamic_rotate %237 by %c96_i32_73 dim 1 : vector<8x128xf32>, i32 -> vector<8x128xf32>
    %c64_i32_74 = arith.constant 64 : i32
    %239 = tpu.dynamic_rotate %237 by %c64_i32_74 dim 1 : vector<8x128xf32>, i32 -> vector<8x128xf32>
    %cst_75 = arith.constant 2.000000e+00 : f32
    %240 = vector.broadcast %cst_75 : f32 to vector<8x128xf32>
    %241 = arith.mulf %240, %239 : vector<8x128xf32>
    %cst_76 = arith.constant 1.000000e+00 : f32
    %242 = vector.broadcast %cst_76 : f32 to vector<8x128xf32>
    %243 = arith.subf %241, %242 : vector<8x128xf32>
    %c32_i32_77 = arith.constant 32 : i32
    %244 = tpu.dynamic_rotate %237 by %c32_i32_77 dim 1 : vector<8x128xf32>, i32 -> vector<8x128xf32>
    %245 = arith.mulf %238, %211 : vector<8x128xf32>
    %246 = arith.mulf %237, %243 : vector<8x128xf32>
    %247 = arith.addf %245, %246 : vector<8x128xf32>
    %cst_78 = arith.constant 2.000000e+00 : f32
    %248 = vector.broadcast %cst_78 : f32 to vector<8x128xf32>
    %249 = arith.mulf %248, %247 : vector<8x128xf32>
    %250 = arith.negf %249 : vector<8x128xf32>
    %251 = math.exp %250 : vector<8x128xf32>
    %cst_79 = arith.constant 1.000000e+00 : f32
    %252 = vector.broadcast %cst_79 : f32 to vector<8x128xf32>
    %253 = arith.addf %252, %251 : vector<8x128xf32>
    %254 = arith.divf %252, %253 : vector<8x128xf32>
    %cst_80 = arith.constant 2.000000e+00 : f32
    %255 = vector.broadcast %cst_80 : f32 to vector<8x128xf32>
    %256 = arith.mulf %255, %254 : vector<8x128xf32>
    %cst_81 = arith.constant 1.000000e+00 : f32
    %257 = vector.broadcast %cst_81 : f32 to vector<8x128xf32>
    %258 = arith.subf %256, %257 : vector<8x128xf32>
    %259 = arith.mulf %244, %258 : vector<8x128xf32>
    %260 = vector.extract_strided_slice %0 {offsets = [0, 7], sizes = [8, 1], strides = [1, 1]} : vector<8x8xf32> to vector<8x1xf32>
    %261 = vector.broadcast %260 : vector<8x1xf32> to vector<8x128xf32>
    %262 = vector.broadcast %2 : vector<1x128xf32> to vector<8x128xf32>
    %263 = arith.mulf %261, %262 : vector<8x128xf32>
    %264 = vector.broadcast %3 : vector<1x128xf32> to vector<8x128xf32>
    %265 = arith.addf %263, %264 : vector<8x128xf32>
    %266 = vector.extract_strided_slice %259 {offsets = [0, 0], sizes = [8, 12], strides = [1, 1]} : vector<8x128xf32> to vector<8x12xf32>
    %cst_82 = arith.constant dense<0.000000e+00> : vector<8x128xf32>
    %267 = tpu.matmul %266, %1, %cst_82 {dimension_numbers = #tpu.dot_dimension_numbers<[1], [0], [0], [1], [0, 0, 1, 1], [], []>} : vector<8x12xf32>, vector<12x128xf32>, vector<8x128xf32> -> vector<8x128xf32>
    %268 = arith.addf %265, %267 : vector<8x128xf32>
    %269 = arith.negf %268 : vector<8x128xf32>
    %270 = math.exp %269 : vector<8x128xf32>
    %cst_83 = arith.constant 1.000000e+00 : f32
    %271 = vector.broadcast %cst_83 : f32 to vector<8x128xf32>
    %272 = arith.addf %271, %270 : vector<8x128xf32>
    %273 = arith.divf %271, %272 : vector<8x128xf32>
    %c96_i32_84 = arith.constant 96 : i32
    %274 = tpu.dynamic_rotate %273 by %c96_i32_84 dim 1 : vector<8x128xf32>, i32 -> vector<8x128xf32>
    %c64_i32_85 = arith.constant 64 : i32
    %275 = tpu.dynamic_rotate %273 by %c64_i32_85 dim 1 : vector<8x128xf32>, i32 -> vector<8x128xf32>
    %cst_86 = arith.constant 2.000000e+00 : f32
    %276 = vector.broadcast %cst_86 : f32 to vector<8x128xf32>
    %277 = arith.mulf %276, %275 : vector<8x128xf32>
    %cst_87 = arith.constant 1.000000e+00 : f32
    %278 = vector.broadcast %cst_87 : f32 to vector<8x128xf32>
    %279 = arith.subf %277, %278 : vector<8x128xf32>
    %c32_i32_88 = arith.constant 32 : i32
    %280 = tpu.dynamic_rotate %273 by %c32_i32_88 dim 1 : vector<8x128xf32>, i32 -> vector<8x128xf32>
    %281 = arith.mulf %274, %247 : vector<8x128xf32>
    %282 = arith.mulf %273, %279 : vector<8x128xf32>
    %283 = arith.addf %281, %282 : vector<8x128xf32>
    %cst_89 = arith.constant 2.000000e+00 : f32
    %284 = vector.broadcast %cst_89 : f32 to vector<8x128xf32>
    %285 = arith.mulf %284, %283 : vector<8x128xf32>
    %286 = arith.negf %285 : vector<8x128xf32>
    %287 = math.exp %286 : vector<8x128xf32>
    %cst_90 = arith.constant 1.000000e+00 : f32
    %288 = vector.broadcast %cst_90 : f32 to vector<8x128xf32>
    %289 = arith.addf %288, %287 : vector<8x128xf32>
    %290 = arith.divf %288, %289 : vector<8x128xf32>
    %cst_91 = arith.constant 2.000000e+00 : f32
    %291 = vector.broadcast %cst_91 : f32 to vector<8x128xf32>
    %292 = arith.mulf %291, %290 : vector<8x128xf32>
    %cst_92 = arith.constant 1.000000e+00 : f32
    %293 = vector.broadcast %cst_92 : f32 to vector<8x128xf32>
    %294 = arith.subf %292, %293 : vector<8x128xf32>
    %295 = arith.mulf %280, %294 : vector<8x128xf32>
    %296 = vector.extract_strided_slice %0 {offsets = [0, 7], sizes = [8, 1], strides = [1, 1]} : vector<8x8xf32> to vector<8x1xf32>
    %297 = vector.broadcast %296 : vector<8x1xf32> to vector<8x128xf32>
    %298 = vector.broadcast %4 : vector<1x128xf32> to vector<8x128xf32>
    %299 = arith.mulf %297, %298 : vector<8x128xf32>
    %300 = vector.broadcast %5 : vector<1x128xf32> to vector<8x128xf32>
    %301 = arith.addf %299, %300 : vector<8x128xf32>
    %cst_93 = arith.constant 0.000000e+00 : f32
    %302 = vector.broadcast %cst_93 : f32 to vector<8x128xf32>
    %303 = arith.negf %301 : vector<8x128xf32>
    %304 = math.exp %303 : vector<8x128xf32>
    %cst_94 = arith.constant 1.000000e+00 : f32
    %305 = vector.broadcast %cst_94 : f32 to vector<8x128xf32>
    %306 = arith.addf %305, %304 : vector<8x128xf32>
    %307 = arith.divf %305, %306 : vector<8x128xf32>
    %c96_i32_95 = arith.constant 96 : i32
    %308 = tpu.dynamic_rotate %307 by %c96_i32_95 dim 1 : vector<8x128xf32>, i32 -> vector<8x128xf32>
    %c64_i32_96 = arith.constant 64 : i32
    %309 = tpu.dynamic_rotate %307 by %c64_i32_96 dim 1 : vector<8x128xf32>, i32 -> vector<8x128xf32>
    %cst_97 = arith.constant 2.000000e+00 : f32
    %310 = vector.broadcast %cst_97 : f32 to vector<8x128xf32>
    %311 = arith.mulf %310, %309 : vector<8x128xf32>
    %cst_98 = arith.constant 1.000000e+00 : f32
    %312 = vector.broadcast %cst_98 : f32 to vector<8x128xf32>
    %313 = arith.subf %311, %312 : vector<8x128xf32>
    %c32_i32_99 = arith.constant 32 : i32
    %314 = tpu.dynamic_rotate %307 by %c32_i32_99 dim 1 : vector<8x128xf32>, i32 -> vector<8x128xf32>
    %315 = arith.mulf %308, %302 : vector<8x128xf32>
    %316 = arith.mulf %307, %313 : vector<8x128xf32>
    %317 = arith.addf %315, %316 : vector<8x128xf32>
    %cst_100 = arith.constant 2.000000e+00 : f32
    %318 = vector.broadcast %cst_100 : f32 to vector<8x128xf32>
    %319 = arith.mulf %318, %317 : vector<8x128xf32>
    %320 = arith.negf %319 : vector<8x128xf32>
    %321 = math.exp %320 : vector<8x128xf32>
    %cst_101 = arith.constant 1.000000e+00 : f32
    %322 = vector.broadcast %cst_101 : f32 to vector<8x128xf32>
    %323 = arith.addf %322, %321 : vector<8x128xf32>
    %324 = arith.divf %322, %323 : vector<8x128xf32>
    %cst_102 = arith.constant 2.000000e+00 : f32
    %325 = vector.broadcast %cst_102 : f32 to vector<8x128xf32>
    %326 = arith.mulf %325, %324 : vector<8x128xf32>
    %cst_103 = arith.constant 1.000000e+00 : f32
    %327 = vector.broadcast %cst_103 : f32 to vector<8x128xf32>
    %328 = arith.subf %326, %327 : vector<8x128xf32>
    %329 = arith.mulf %314, %328 : vector<8x128xf32>
    %330 = tpu.iota {dimensions = array<i32: 1>} : vector<8x128xi32>
    %c12_i32 = arith.constant 12 : i32
    %331 = vector.broadcast %c12_i32 : i32 to vector<8x128xi32>
    %332 = arith.cmpi slt, %330, %331 : vector<8x128xi32>
    %cst_104 = arith.constant 0.000000e+00 : f32
    %333 = vector.broadcast %cst_104 : f32 to vector<8x128xf32>
    %334 = arith.select %332, %295, %333 : vector<8x128xi1>, vector<8x128xf32>
    %c12_i32_105 = arith.constant 12 : i32
    %335 = vector.broadcast %c12_i32_105 : i32 to vector<8x128xi32>
    %336 = arith.cmpi slt, %330, %335 : vector<8x128xi32>
    %cst_106 = arith.constant 0.000000e+00 : f32
    %337 = vector.broadcast %cst_106 : f32 to vector<8x128xf32>
    %338 = arith.select %336, %329, %337 : vector<8x128xi1>, vector<8x128xf32>
    %c12_i32_107 = arith.constant 12 : i32
    %339 = tpu.dynamic_rotate %338 by %c12_i32_107 dim 1 : vector<8x128xf32>, i32 -> vector<8x128xf32>
    %340 = arith.addf %334, %339 : vector<8x128xf32>
    %c16 = arith.constant 16 : index
    %c0_108 = arith.constant 0 : index
    %341 = vector.load %arg3[%c16, %c0_108] : memref<104x128xf32, #tpu.memory_space<vmem>>, vector<24x128xf32>
    %c88 = arith.constant 88 : index
    %c0_109 = arith.constant 0 : index
    %342 = vector.load %arg3[%c88, %c0_109] : memref<104x128xf32, #tpu.memory_space<vmem>>, vector<1x128xf32>
    %c40 = arith.constant 40 : index
    %c0_110 = arith.constant 0 : index
    %343 = vector.load %arg3[%c40, %c0_110] : memref<104x128xf32, #tpu.memory_space<vmem>>, vector<12x128xf32>
    %c96 = arith.constant 96 : index
    %c0_111 = arith.constant 0 : index
    %344 = vector.load %arg3[%c96, %c0_111] : memref<104x128xf32, #tpu.memory_space<vmem>>, vector<1x128xf32>
    %345 = vector.extract_strided_slice %340 {offsets = [0, 0], sizes = [8, 24], strides = [1, 1]} : vector<8x128xf32> to vector<8x24xf32>
    %cst_112 = arith.constant dense<0.000000e+00> : vector<8x128xf32>
    %346 = tpu.matmul %345, %341, %cst_112 {dimension_numbers = #tpu.dot_dimension_numbers<[1], [0], [0], [1], [0, 0, 1, 1], [], []>} : vector<8x24xf32>, vector<24x128xf32>, vector<8x128xf32> -> vector<8x128xf32>
    %347 = vector.broadcast %342 : vector<1x128xf32> to vector<8x128xf32>
    %348 = arith.addf %346, %347 : vector<8x128xf32>
    %cst_113 = arith.constant 0.000000e+00 : f32
    %349 = vector.broadcast %cst_113 : f32 to vector<8x128xf32>
    %350 = arith.maximumf %348, %349 : vector<8x128xf32>
    %351 = vector.extract_strided_slice %350 {offsets = [0, 0], sizes = [8, 12], strides = [1, 1]} : vector<8x128xf32> to vector<8x12xf32>
    %cst_114 = arith.constant dense<0.000000e+00> : vector<8x128xf32>
    %352 = tpu.matmul %351, %343, %cst_114 {dimension_numbers = #tpu.dot_dimension_numbers<[1], [0], [0], [1], [0, 0, 1, 1], [], []>} : vector<8x12xf32>, vector<12x128xf32>, vector<8x128xf32> -> vector<8x128xf32>
    %353 = vector.broadcast %344 : vector<1x128xf32> to vector<8x128xf32>
    %354 = arith.addf %352, %353 : vector<8x128xf32>
    %355 = vector.extract_strided_slice %354 {offsets = [0, 0], sizes = [8, 12], strides = [1, 1]} : vector<8x128xf32> to vector<8x12xf32>
    %c116_i32 = arith.constant 116 : i32
    %356 = tpu.dynamic_rotate %354 by %c116_i32 dim 1 : vector<8x128xf32>, i32 -> vector<8x128xf32>
    %357 = vector.extract_strided_slice %356 {offsets = [0, 0], sizes = [8, 12], strides = [1, 1]} : vector<8x128xf32> to vector<8x12xf32>
    %cst_115 = arith.constant 5.000000e-01 : f32
    %358 = vector.broadcast %cst_115 : f32 to vector<8x12xf32>
    %359 = arith.mulf %358, %357 : vector<8x12xf32>
    %360 = math.exp %359 : vector<8x12xf32>
    %c0_116 = arith.constant 0 : index
    %c0_117 = arith.constant 0 : index
    %361 = vector.load %arg2[%c0_116, %c0_117] : memref<8x12xf32, #tpu.memory_space<vmem>>, vector<8x12xf32>
    %362 = arith.mulf %361, %360 : vector<8x12xf32>
    %363 = arith.addf %362, %355 : vector<8x12xf32>
    %c0_118 = arith.constant 0 : index
    %c0_119 = arith.constant 0 : index
    %364 = vector.load %arg4[%c0_118, %c0_119] : memref<8x12xf32, #tpu.memory_space<vmem>>, vector<8x12xf32>
    tpu.vector_store %arg4[%c0_118, %c0_119], %363 {strides = array<i32>} : memref<8x12xf32, #tpu.memory_space<vmem>>, vector<8x12xf32>,
    %365 = vector.extract_strided_slice %354 {offsets = [0, 0], sizes = [8, 24], strides = [1, 1]} : vector<8x128xf32> to vector<8x24xf32>
    %c0_120 = arith.constant 0 : index
    %c0_121 = arith.constant 0 : index
    %366 = vector.load %arg5[%c0_120, %c0_121] : memref<8x24xf32, #tpu.memory_space<vmem>>, vector<8x24xf32>
    tpu.vector_store %arg5[%c0_120, %c0_121], %365 {strides = array<i32>} : memref<8x24xf32, #tpu.memory_space<vmem>>, vector<8x24xf32>,
    return
  }
  func.func @transform_0(%arg0: i32) -> (i32, i32) {
    %c0_i32 = arith.constant 0 : i32
    %c0_i32_0 = arith.constant 0 : i32
    return %arg0, %c0_i32 : i32, i32
  }
  func.func @transform_1(%arg0: i32) -> (i32, i32) {
    %c0_i32 = arith.constant 0 : i32
    %c0_i32_0 = arith.constant 0 : i32
    return %arg0, %c0_i32 : i32, i32
  }
  func.func @transform_2(%arg0: i32) -> (i32, i32) {
    %c0_i32 = arith.constant 0 : i32
    %c0_i32_0 = arith.constant 0 : i32
    %c0_i32_1 = arith.constant 0 : i32
    return %c0_i32, %c0_i32_0 : i32, i32
  }
  func.func @transform_3(%arg0: i32) -> (i32, i32) {
    %c0_i32 = arith.constant 0 : i32
    %c0_i32_0 = arith.constant 0 : i32
    return %arg0, %c0_i32 : i32, i32
  }
  func.func @transform_4(%arg0: i32) -> (i32, i32) {
    %c0_i32 = arith.constant 0 : i32
    %c0_i32_0 = arith.constant 0 : i32
    return %arg0, %c0_i32 : i32, i32
  }
}

</mosaic_0001>

<bundles_post_ra>
// kernel: tpu_custom_call.1
= control target key start
LH: loop header
LB: loop body
LE: loop exit
PB: predicated region body
PF: predicated region fallthrough
CT: control target
= control target key end

     0   :  { %10 = vsyncpa [#allocation3], 0  ;;  %s1351_s0 = inlined_call_operand.hbm [shape: f32[8,8], index: 0, kind: input, shape index: {}]   ;;  %s1352_s1 = inlined_call_operand.hbm [shape: f32[8,12], index: 1, kind: input, shape index: {}]   ;;  %s1353_s2 = inlined_call_operand.hbm [shape: f32[104,128], index: 2, kind: input, shape index: {}]   ;;  %s1354_s3 = inlined_call_operand.hbm [shape: f32[8,12], index: 3, kind: output, shape index: {0}]   ;;  %s1355_s4 = inlined_call_operand.hbm [shape: f32[8,24], index: 4, kind: output, shape index: {1}]  }
   0x1   :  { %11 = vsyncpa [#allocation6], 0 }
   0x2   :  { %12 = vsyncpa [#allocation4], 0  ;;  %s30_s17 = sshll.u32 %s1352_s1, 4  ;;  %s31_s17 = int_to_ptr.hbm [resolvable:$true] %s30_s17 }
   0x3   :  { %13 = vsyncpa [#allocation10], 0  ;;  %s1200_s18 = smov [#allocation5]   ;;  %s19_s22 = sshll.u32 %s1351_s0, 4  ;;  %s20_s22 = int_to_ptr.hbm [resolvable:$true] %s19_s22 }
   0x4   :  { %s32_s19 = sshll.u32 %s1200_s18, 4  ;;  %s1201_s23 = smov [#allocation2]   ;;  %s33_s19 = int_to_ptr.vmem [resolvable:$true] %s32_s19 }
   0x5   :  { %35 = dma.hbm_to_vmem [thread:$0]  %s31_s17, 128, %s33_s19, [#allocation6]  }
   0x6   :  { %s21_s24 = sshll.u32 %s1201_s23, 4  ;;  %s40_s27 = sshll.u32 %s1353_s2, 4  ;;  %s22_s24 = int_to_ptr.vmem [resolvable:$true] %s21_s24  ;;  %s41_s27 = int_to_ptr.hbm [resolvable:$true] %s40_s27 }
   0x7   :  { %24 = dma.hbm_to_vmem [thread:$0]  %s20_s22, 128, %s22_s24, [#allocation3]  }
   0x8   :  { %s1202_s1 = smov [#allocation7]   ;;  %s1203_s29 = smov 128  }
   0x9   :  { %s42_s28 = sshll.u32 %s1202_s1, 4  ;;  %s1204_s30 = smov 8   ;;  %s43_s28 = int_to_ptr.vmem [resolvable:$true] %s42_s28 }
   0xa   :  { %48 = dma.hbm_to_vmem [thread:$0]  %s41_s27, 1664, %s43_s28, [#allocation6], %s1203_s29, %s1203_s29, %s1204_s30  }
   0xb   :  { %1192 = dma.done.wait [#allocation3], 128  }
   0xc   :  { %1193 = vsyncadd [#allocation3], 4294967168 }
   0xd   :  { %1194 = dma.done.wait [#allocation6], 1792  }
   0xe   :  { %1195 = vsyncadd [#allocation6], 4294965504  ;;  %v1205_v0 = vmov 0   ;;  %vm81_vm0 = vcmask 1043456   ;;  %v63_v1 = vld [vmem:[#allocation7 + $0x8] sm:$0xf] }
   0xf   :  { %984 = vset.pattern.permute.xlu0 %v1205_v0  ;;  %v62_v2 = vld [vmem:[#allocation7] sm:$0xff]  ;;  %v1255_v3 = vld [vmem:[#allocation2] sm:$0xff]  ;;  %909 = vmatpush.msk.msra.mxu0 %vm81_vm0, %v63_v1  ;;  %v1206_v4 = vmov 0.0   ;;  %v1266_v5 = vld [vmem:[#allocation7 + $0x38] ss:$0 sm:$0xff]  ;;  %s1207_s0 = smov 96  }
  0x10   :  { %70 = vperm.xlu0 %984, %v1255_v3   ;;  %914 = vmatpush.msk.msra.mxu1 %vm81_vm0, %v63_v1  ;;  %v1269_v8 = vld [vmem:[#allocation7 + $0x40] ss:$0 sm:$0xff]  ;;  %s1208_s2 = smov 64   ;;  %s1209_s5 = smov 32   ;;  %v1210_v34 = vmov 1   ;;  %vm77_vm9 = vcmask 97280  }
  0x11   :  { %920 = vmatpush.msk.msra.mxu2 %vm81_vm0, %v63_v1  ;;  %100 = vmatpush.msra.mxu0 %v62_v2  ;;  %s1217_s6 = smov 12   ;;  %s1218_s7 = smov 116  }
  0x12   :  { %926 = vmatpush.msk.msra.mxu3 %vm81_vm0, %v63_v1  ;;  %101 = vmatmul.f32.vlgmr.msra.gmra.mxu0 %v1206_v4  ;;  %s1219_s8 = smov [#allocation9]   ;;  %s893_s12 = sshll.u32 %s1355_s4, 4  ;;  %s894_s12 = int_to_ptr.hbm [resolvable:$true] %s893_s12 }
  0x13   :  { %183 = vmatpush.msra.mxu1 %v62_v2  ;;  %266 = vmatpush.msra.mxu2 %v62_v2  ;;  %s891_s9 = sshll.u32 %s1219_s8, 4  ;;  %s1220_s13 = smov [#allocation8]   ;;  %s892_s9 = int_to_ptr.vmem [resolvable:$true] %s891_s9 }
  0x14   :  { %349 = vmatpush.msra.mxu3 %v62_v2  ;;  %932 = vmatpush.msk.msrb.mxu0 %vm81_vm0, %v63_v1  ;;  %s880_s14 = sshll.u32 %s1220_s13, 4  ;;  %s882_s17 = sshll.u32 %s1354_s3, 4  ;;  %s881_s14 = int_to_ptr.vmem [resolvable:$true] %s880_s14  ;;  %s883_s17 = int_to_ptr.hbm [resolvable:$true] %s882_s17 }
  0x15   :  { %938 = vmatpush.msk.msrb.mxu1 %vm81_vm0, %v63_v1  ;;  %944 = vmatpush.msk.msrb.mxu2 %vm81_vm0, %v63_v1 }
  0x16   :  { %950 = vmatpush.msk.msrb.mxu3 %vm81_vm0, %v63_v1  ;;  %432 = vmatpush.msrb.mxu0 %v62_v2 }
  0x17   :  { %515 = vmatpush.msrb.mxu1 %v62_v2  ;;  %598 = vmatpush.msrb.mxu2 %v62_v2 }
  0x18   :  { %681 = vmatpush.msrb.mxu3 %v62_v2  ;;  %985 = vset.pattern.permute.xlu2 %v1210_v34 }
  0x19   :  { %160 = vperm.xlu2 %985, %v1255_v3  }
  0x73   :  { %v161_v51 = vpop.permute.xlu2 %160 }
  0x74   :  { %v163_v52 = vmul.f32 %v1266_v5, %v161_v51 }
  0x76   :  { %v164_v53 = vadd.f32 %v1269_v8, %v163_v52 }
  0x82   :  { %v71_v6 = vpop.permute.xlu0 %70 }
  0x83   :  { %v74_v7 = vmul.f32 %v1266_v5, %v71_v6 }
  0x85   :  { %v76_v9 = vadd.f32 %v1269_v8, %v74_v7 }
  0x8f   :  { %v102_v10 = vpop.f32.mrf.mxu0 }
  0x90   :  { %v105_v11 = vadd.f32 %v102_v10, %v76_v9 }
  0x92   :  { %v910_v12 = vmul.f32 -1.442695, %v105_v11 }
  0x94   :  { %998 = vpow2.f32 %v910_v12 }
  0x9a   :  { %v999_v13 = vpop.eup %998 }
  0x9b   :  { %v109_v14 = vadd.f32 1.0, %v999_v13 }
  0x9d   :  { %1000 = vrcp.f32 %v109_v14  ;;  %v121_v18 = vand.u32 2147483648, %v109_v14  ;;  %v119_v20 = vand.u32 2147483647, %v109_v14  ;;  %vm115_vm2 = vweird.f32 %v109_v14 }
  0x9f   :  { %v122_v22 = vor.u32 1.1754944e-38, %v121_v18  ;;  %vm120_vm4 = vcmp.eq.f32.partialorder %v119_v20, 8.507059e+37 }
  0xa3   :  { %v1001_v15 = vpop.eup %1000 }
  0xa4   :  { %v111_v16 = vmul.f32 %v1001_v15, %v109_v14  ;;  %vm116_vm1 = vweird.f32 %v1001_v15 }
  0xa5   :  { %vm117_vm3 = vmor %vm115_vm2, %vm116_vm1 }
  0xa6   :  { %v112_v17 = vsub.f32 1.0, %v111_v16 }
  0xa8   :  { %v113_v19 = vmul.f32 %v1001_v15, %v112_v17  ;;  %v1211_v17 = vmov 2  }
  0xa9   :  { %986 = vset.pattern.permute.xlu2 %v1211_v17 }
  0xaa   :  { %v114_v21 = vadd.f32 %v1001_v15, %v113_v19 }
  0xac   :  { %v118_v23 = vsel %vm117_vm3, %v1001_v15, %v114_v21 }
  0xad   :  { %v123_v24 = vsel %vm120_vm4, %v122_v22, %v118_v23 }
  0xae   :  { %125 = vrot.lane.b32.xlu1 %v123_v24, %s1207_s0  ;;  %127 = vrot.lane.b32.xlu0 %v123_v24, %s1208_s2 }
  0xb6   :  { %131 = vrot.lane.b32.xlu1 %v123_v24, %s1209_s5 }
 0x120   :  { %v128_v25 = vpop.permute.xlu0 %127  ;;  %v126_v27 = vpop.permute.xlu1 %125 }
 0x121   :  { %v129_v26 = vmul.f32 2.0, %v128_v25  ;;  %v133_v29 = vmul.f32 0.0, %v126_v27 }
 0x123   :  { %v911_v28 = vadd.f32 -1.0, %v129_v26 }
 0x125   :  { %v134_v30 = vmul.f32 %v911_v28, %v123_v24 }
 0x127   :  { %v135_v31 = vadd.f32 %v134_v30, %v133_v29 }
 0x128   :  { %v132_v49 = vpop.permute.xlu1 %131 }
 0x129   :  { %v912_v32 = vmul.f32 -2.0, %v135_v31 }
 0x12b   :  { %v138_v33 = vmul.f32 1.442695, %v912_v32 }
 0x12d   :  { %1002 = vpow2.f32 %v138_v33 }
 0x133   :  { %v1003_v35 = vpop.eup %1002 }
 0x134   :  { %v140_v36 = vadd.f32 1.0, %v1003_v35 }
 0x136   :  { %1004 = vrcp.f32 %v140_v36  ;;  %v152_v40 = vand.u32 2147483648, %v140_v36  ;;  %v150_v42 = vand.u32 2147483647, %v140_v36  ;;  %vm146_vm6 = vweird.f32 %v140_v36 }
 0x138   :  { %v153_v44 = vor.u32 1.1754944e-38, %v152_v40  ;;  %vm151_vm8 = vcmp.eq.f32.partialorder %v150_v42, 8.507059e+37 }
 0x13c   :  { %v1005_v37 = vpop.eup %1004 }
 0x13d   :  { %v142_v38 = vmul.f32 %v1005_v37, %v140_v36  ;;  %vm147_vm5 = vweird.f32 %v1005_v37 }
 0x13e   :  { %vm148_vm7 = vmor %vm146_vm6, %vm147_vm5 }
 0x13f   :  { %v143_v39 = vsub.f32 1.0, %v142_v38 }
 0x141   :  { %v144_v41 = vmul.f32 %v1005_v37, %v143_v39 }
 0x143   :  { %v145_v43 = vadd.f32 %v1005_v37, %v144_v41 }
 0x145   :  { %v149_v45 = vsel %vm148_vm7, %v1005_v37, %v145_v43 }
 0x146   :  { %v154_v46 = vsel %vm151_vm8, %v153_v44, %v149_v45 }
 0x147   :  { %v156_v47 = vmul.f32 2.0, %v154_v46 }
 0x149   :  { %v913_v48 = vadd.f32 -1.0, %v156_v47 }
 0x14b   :  { %v158_v50 = vmul.f32 %v913_v48, %v132_v49 }
 0x14d   :  { %915 = vmatmul.msk.f32.vlgmr.msra.gmra.mxu1 %vm77_vm9, %v158_v50 }
 0x1ca   :  { %v185_v54 = vpop.f32.mrf.mxu1 }
 0x1cb   :  { %v188_v55 = vadd.f32 %v185_v54, %v164_v53 }
 0x1cd   :  { %v916_v56 = vmul.f32 -1.442695, %v188_v55 }
 0x1cf   :  { %1006 = vpow2.f32 %v916_v56 }
 0x1d5   :  { %v1007_v57 = vpop.eup %1006 }
 0x1d6   :  { %v192_v58 = vadd.f32 1.0, %v1007_v57 }
 0x1d8   :  { %1008 = vrcp.f32 %v192_v58  ;;  %v204_v62 = vand.u32 2147483648, %v192_v58  ;;  %v202_v0 = vand.u32 2147483647, %v192_v58  ;;  %vm198_vm11 = vweird.f32 %v192_v58 }
 0x1da   :  { %v205_v2 = vor.u32 1.1754944e-38, %v204_v62  ;;  %vm203_vm13 = vcmp.eq.f32.partialorder %v202_v0, 8.507059e+37 }
 0x1de   :  { %v1009_v59 = vpop.eup %1008 }
 0x1df   :  { %v194_v60 = vmul.f32 %v1009_v59, %v192_v58  ;;  %vm199_vm10 = vweird.f32 %v1009_v59 }
 0x1e0   :  { %vm200_vm12 = vmor %vm198_vm11, %vm199_vm10 }
 0x1e1   :  { %v195_v61 = vsub.f32 1.0, %v194_v60 }
 0x1e3   :  { %v196_v63 = vmul.f32 %v1009_v59, %v195_v61  ;;  %v1212_v61 = vmov 3  }
 0x1e4   :  { %987 = vset.pattern.permute.xlu0 %v1212_v61 }
 0x1e5   :  { %v197_v1 = vadd.f32 %v1009_v59, %v196_v63 }
 0x1e7   :  { %v201_v4 = vsel %vm200_vm12, %v1009_v59, %v197_v1 }
 0x1e8   :  { %v206_v6 = vsel %vm203_vm13, %v205_v2, %v201_v4 }
 0x1e9   :  { %214 = vrot.lane.b32.xlu1 %v206_v6, %s1209_s5  ;;  %208 = vrot.lane.b32.xlu0 %v206_v6, %s1207_s0 }
 0x1ea   :  { %210 = vrot.lane.b32.xlu2 %v206_v6, %s1208_s2 }
 0x1f2   :  { %243 = vperm.xlu2 %986, %v1255_v3  }
 0x244   :  { %v211_v7 = vpop.permute.xlu2 %210 }
 0x245   :  { %v212_v9 = vmul.f32 2.0, %v211_v7 }
 0x247   :  { %v917_v10 = vadd.f32 -1.0, %v212_v9 }
 0x249   :  { %v217_v12 = vmul.f32 %v917_v10, %v206_v6 }
 0x24c   :  { %v244_v34 = vpop.permute.xlu2 %243 }
 0x24d   :  { %v246_v35 = vmul.f32 %v1266_v5, %v244_v34 }
 0x24f   :  { %v247_v36 = vadd.f32 %v1269_v8, %v246_v35 }
 0x25b   :  { %v209_v11 = vpop.permute.xlu0 %208  ;;  %v215_v32 = vpop.permute.xlu1 %214 }
 0x25c   :  { %v216_v13 = vmul.f32 %v209_v11, %v135_v31 }
 0x25e   :  { %v218_v14 = vadd.f32 %v217_v12, %v216_v13 }
 0x260   :  { %v918_v15 = vmul.f32 -2.0, %v218_v14 }
 0x262   :  { %v221_v16 = vmul.f32 1.442695, %v918_v15 }
 0x264   :  { %1010 = vpow2.f32 %v221_v16 }
 0x26a   :  { %v1011_v18 = vpop.eup %1010 }
 0x26b   :  { %v223_v19 = vadd.f32 1.0, %v1011_v18 }
 0x26d   :  { %1012 = vrcp.f32 %v223_v19  ;;  %v235_v23 = vand.u32 2147483648, %v223_v19  ;;  %v233_v25 = vand.u32 2147483647, %v223_v19  ;;  %vm229_vm15 = vweird.f32 %v223_v19 }
 0x26f   :  { %v236_v27 = vor.u32 1.1754944e-38, %v235_v23  ;;  %vm234_vm2 = vcmp.eq.f32.partialorder %v233_v25, 8.507059e+37 }
 0x273   :  { %v1013_v20 = vpop.eup %1012 }
 0x274   :  { %v225_v21 = vmul.f32 %v1013_v20, %v223_v19  ;;  %vm230_vm14 = vweird.f32 %v1013_v20 }
 0x275   :  { %vm231_vm1 = vmor %vm229_vm15, %vm230_vm14 }
 0x276   :  { %v226_v22 = vsub.f32 1.0, %v225_v21 }
 0x278   :  { %v227_v24 = vmul.f32 %v1013_v20, %v226_v22 }
 0x27a   :  { %v228_v26 = vadd.f32 %v1013_v20, %v227_v24 }
 0x27c   :  { %v232_v28 = vsel %vm231_vm1, %v1013_v20, %v228_v26 }
 0x27d   :  { %v237_v29 = vsel %vm234_vm2, %v236_v27, %v232_v28 }
 0x27e   :  { %v239_v30 = vmul.f32 2.0, %v237_v29 }
 0x280   :  { %v919_v31 = vadd.f32 -1.0, %v239_v30 }
 0x282   :  { %v241_v33 = vmul.f32 %v919_v31, %v215_v32 }
 0x284   :  { %921 = vmatmul.msk.f32.vlgmr.msra.gmra.mxu2 %vm77_vm9, %v241_v33 }
 0x307   :  { %v268_v37 = vpop.f32.mrf.mxu2 }
 0x308   :  { %v271_v38 = vadd.f32 %v268_v37, %v247_v36 }
 0x30a   :  { %v922_v39 = vmul.f32 -1.442695, %v271_v38 }
 0x30c   :  { %1014 = vpow2.f32 %v922_v39 }
 0x312   :  { %v1015_v40 = vpop.eup %1014 }
 0x313   :  { %v275_v41 = vadd.f32 1.0, %v1015_v40 }
 0x315   :  { %1016 = vrcp.f32 %v275_v41  ;;  %v287_v45 = vand.u32 2147483648, %v275_v41  ;;  %v285_v47 = vand.u32 2147483647, %v275_v41  ;;  %vm281_vm4 = vweird.f32 %v275_v41 }
 0x317   :  { %v288_v49 = vor.u32 1.1754944e-38, %v287_v45  ;;  %vm286_vm6 = vcmp.eq.f32.partialorder %v285_v47, 8.507059e+37 }
 0x31b   :  { %v1017_v42 = vpop.eup %1016 }
 0x31c   :  { %v277_v43 = vmul.f32 %v1017_v42, %v275_v41  ;;  %vm282_vm3 = vweird.f32 %v1017_v42 }
 0x31d   :  { %vm283_vm5 = vmor %vm281_vm4, %vm282_vm3 }
 0x31e   :  { %v278_v44 = vsub.f32 1.0, %v277_v43 }
 0x320   :  { %v279_v46 = vmul.f32 %v1017_v42, %v278_v44  ;;  %v1213_v44 = vmov 4  }
 0x321   :  { %988 = vset.pattern.permute.xlu2 %v1213_v44 }
 0x322   :  { %v280_v48 = vadd.f32 %v1017_v42, %v279_v46 }
 0x324   :  { %v284_v50 = vsel %vm283_vm5, %v1017_v42, %v280_v48 }
 0x325   :  { %v289_v51 = vsel %vm286_vm6, %v288_v49, %v284_v50 }
 0x326   :  { %297 = vrot.lane.b32.xlu2 %v289_v51, %s1209_s5  ;;  %291 = vrot.lane.b32.xlu1 %v289_v51, %s1207_s0 }
 0x327   :  { %293 = vrot.lane.b32.xlu0 %v289_v51, %s1208_s2 }
 0x32f   :  { %326 = vperm.xlu0 %987, %v1255_v3  }
 0x380   :  { %v298_v15 = vpop.permute.xlu2 %297 }
 0x398   :  { %v292_v54 = vpop.permute.xlu1 %291 }
 0x399   :  { %v294_v52 = vpop.permute.xlu0 %293  ;;  %v299_v56 = vmul.f32 %v292_v54, %v218_v14 }
 0x39a   :  { %v295_v53 = vmul.f32 2.0, %v294_v52 }
 0x39c   :  { %v923_v55 = vadd.f32 -1.0, %v295_v53 }
 0x39e   :  { %v300_v57 = vmul.f32 %v923_v55, %v289_v51 }
 0x3a0   :  { %v301_v58 = vadd.f32 %v300_v57, %v299_v56 }
 0x3a1   :  { %v327_v17 = vpop.permute.xlu0 %326 }
 0x3a2   :  { %v924_v59 = vmul.f32 -2.0, %v301_v58  ;;  %v329_v18 = vmul.f32 %v1266_v5, %v327_v17 }
 0x3a4   :  { %v304_v60 = vmul.f32 1.442695, %v924_v59  ;;  %v330_v19 = vadd.f32 %v1269_v8, %v329_v18 }
 0x3a6   :  { %1018 = vpow2.f32 %v304_v60 }
 0x3ac   :  { %v1019_v62 = vpop.eup %1018 }
 0x3ad   :  { %v306_v63 = vadd.f32 1.0, %v1019_v62 }
 0x3af   :  { %1020 = vrcp.f32 %v306_v63  ;;  %v318_v4 = vand.u32 2147483648, %v306_v63  ;;  %v316_v7 = vand.u32 2147483647, %v306_v63  ;;  %vm312_vm8 = vweird.f32 %v306_v63 }
 0x3b1   :  { %v319_v10 = vor.u32 1.1754944e-38, %v318_v4  ;;  %vm317_vm11 = vcmp.eq.f32.partialorder %v316_v7, 8.507059e+37 }
 0x3b5   :  { %v1021_v0 = vpop.eup %1020 }
 0x3b6   :  { %v308_v1 = vmul.f32 %v1021_v0, %v306_v63  ;;  %vm313_vm7 = vweird.f32 %v1021_v0 }
 0x3b7   :  { %vm314_vm10 = vmor %vm312_vm8, %vm313_vm7 }
 0x3b8   :  { %v309_v2 = vsub.f32 1.0, %v308_v1 }
 0x3ba   :  { %v310_v6 = vmul.f32 %v1021_v0, %v309_v2 }
 0x3bc   :  { %v311_v9 = vadd.f32 %v1021_v0, %v310_v6 }
 0x3be   :  { %v315_v11 = vsel %vm314_vm10, %v1021_v0, %v311_v9 }
 0x3bf   :  { %v320_v12 = vsel %vm317_vm11, %v319_v10, %v315_v11 }
 0x3c0   :  { %v322_v13 = vmul.f32 2.0, %v320_v12 }
 0x3c2   :  { %v925_v14 = vadd.f32 -1.0, %v322_v13 }
 0x3c4   :  { %v324_v16 = vmul.f32 %v925_v14, %v298_v15 }
 0x3c6   :  { %927 = vmatmul.msk.f32.vlgmr.msra.gmra.mxu3 %vm77_vm9, %v324_v16 }
 0x449   :  { %v351_v20 = vpop.f32.mrf.mxu3 }
 0x44a   :  { %v354_v21 = vadd.f32 %v351_v20, %v330_v19 }
 0x44c   :  { %v928_v22 = vmul.f32 -1.442695, %v354_v21 }
 0x44e   :  { %1022 = vpow2.f32 %v928_v22 }
 0x454   :  { %v1023_v23 = vpop.eup %1022 }
 0x455   :  { %v358_v24 = vadd.f32 1.0, %v1023_v23 }
 0x457   :  { %1024 = vrcp.f32 %v358_v24  ;;  %v370_v28 = vand.u32 2147483648, %v358_v24  ;;  %v368_v30 = vand.u32 2147483647, %v358_v24  ;;  %vm364_vm13 = vweird.f32 %v358_v24 }
 0x459   :  { %v371_v32 = vor.u32 1.1754944e-38, %v370_v28  ;;  %vm369_vm15 = vcmp.eq.f32.partialorder %v368_v30, 8.507059e+37 }
 0x45d   :  { %v1025_v25 = vpop.eup %1024 }
 0x45e   :  { %v360_v26 = vmul.f32 %v1025_v25, %v358_v24  ;;  %vm365_vm12 = vweird.f32 %v1025_v25 }
 0x45f   :  { %vm366_vm14 = vmor %vm364_vm13, %vm365_vm12 }
 0x460   :  { %v361_v27 = vsub.f32 1.0, %v360_v26 }
 0x462   :  { %v362_v29 = vmul.f32 %v1025_v25, %v361_v27  ;;  %v1214_v27 = vmov 5  }
 0x463   :  { %989 = vset.pattern.permute.xlu0 %v1214_v27 }
 0x464   :  { %v363_v31 = vadd.f32 %v1025_v25, %v362_v29 }
 0x466   :  { %v367_v33 = vsel %vm366_vm14, %v1025_v25, %v363_v31 }
 0x467   :  { %v372_v34 = vsel %vm369_vm15, %v371_v32, %v367_v33 }
 0x468   :  { %374 = vrot.lane.b32.xlu2 %v372_v34, %s1207_s0  ;;  %376 = vrot.lane.b32.xlu1 %v372_v34, %s1208_s2 }
 0x470   :  { %380 = vrot.lane.b32.xlu1 %v372_v34, %s1209_s5  ;;  %409 = vperm.xlu2 %988, %v1255_v3  }
 0x4c2   :  { %v375_v37 = vpop.permute.xlu2 %374 }
 0x4c3   :  { %v382_v39 = vmul.f32 %v375_v37, %v301_v58 }
 0x4ca   :  { %v410_v61 = vpop.permute.xlu2 %409 }
 0x4cb   :  { %v412_v62 = vmul.f32 %v1266_v5, %v410_v61 }
 0x4cd   :  { %v413_v63 = vadd.f32 %v1269_v8, %v412_v62 }
 0x4da   :  { %v377_v35 = vpop.permute.xlu1 %376 }
 0x4db   :  { %v378_v36 = vmul.f32 2.0, %v377_v35 }
 0x4dd   :  { %v929_v38 = vadd.f32 -1.0, %v378_v36 }
 0x4df   :  { %v383_v40 = vmul.f32 %v929_v38, %v372_v34 }
 0x4e1   :  { %v384_v41 = vadd.f32 %v383_v40, %v382_v39 }
 0x4e2   :  { %v381_v59 = vpop.permute.xlu1 %380 }
 0x4e3   :  { %v930_v42 = vmul.f32 -2.0, %v384_v41 }
 0x4e5   :  { %v387_v43 = vmul.f32 1.442695, %v930_v42 }
 0x4e7   :  { %1026 = vpow2.f32 %v387_v43 }
 0x4ed   :  { %v1027_v45 = vpop.eup %1026 }
 0x4ee   :  { %v389_v46 = vadd.f32 1.0, %v1027_v45 }
 0x4f0   :  { %1028 = vrcp.f32 %v389_v46  ;;  %v401_v50 = vand.u32 2147483648, %v389_v46  ;;  %v399_v52 = vand.u32 2147483647, %v389_v46  ;;  %vm395_vm2 = vweird.f32 %v389_v46 }
 0x4f2   :  { %v402_v54 = vor.u32 1.1754944e-38, %v401_v50  ;;  %vm400_vm4 = vcmp.eq.f32.partialorder %v399_v52, 8.507059e+37 }
 0x4f6   :  { %v1029_v47 = vpop.eup %1028 }
 0x4f7   :  { %v391_v48 = vmul.f32 %v1029_v47, %v389_v46  ;;  %vm396_vm1 = vweird.f32 %v1029_v47 }
 0x4f8   :  { %vm397_vm3 = vmor %vm395_vm2, %vm396_vm1 }
 0x4f9   :  { %v392_v49 = vsub.f32 1.0, %v391_v48 }
 0x4fb   :  { %v393_v51 = vmul.f32 %v1029_v47, %v392_v49 }
 0x4fd   :  { %v394_v53 = vadd.f32 %v1029_v47, %v393_v51 }
 0x4ff   :  { %v398_v55 = vsel %vm397_vm3, %v1029_v47, %v394_v53 }
 0x500   :  { %v403_v56 = vsel %vm400_vm4, %v402_v54, %v398_v55 }
 0x501   :  { %v405_v57 = vmul.f32 2.0, %v403_v56 }
 0x503   :  { %v931_v58 = vadd.f32 -1.0, %v405_v57 }
 0x505   :  { %v407_v60 = vmul.f32 %v931_v58, %v381_v59 }
 0x507   :  { %933 = vmatmul.msk.f32.vlgmr.msrb.gmra.mxu0 %vm77_vm9, %v407_v60 }
 0x584   :  { %v434_v0 = vpop.f32.mrf.mxu0 }
 0x585   :  { %v437_v1 = vadd.f32 %v434_v0, %v413_v63 }
 0x587   :  { %v934_v2 = vmul.f32 -1.442695, %v437_v1 }
 0x589   :  { %1030 = vpow2.f32 %v934_v2 }
 0x58f   :  { %v1031_v4 = vpop.eup %1030 }
 0x590   :  { %v441_v6 = vadd.f32 1.0, %v1031_v4 }
 0x592   :  { %1032 = vrcp.f32 %v441_v6  ;;  %v453_v11 = vand.u32 2147483648, %v441_v6  ;;  %v451_v13 = vand.u32 2147483647, %v441_v6  ;;  %vm447_vm6 = vweird.f32 %v441_v6 }
 0x594   :  { %v454_v15 = vor.u32 1.1754944e-38, %v453_v11  ;;  %vm452_vm8 = vcmp.eq.f32.partialorder %v451_v13, 8.507059e+37 }
 0x598   :  { %v1033_v7 = vpop.eup %1032 }
 0x599   :  { %v443_v9 = vmul.f32 %v1033_v7, %v441_v6  ;;  %vm448_vm5 = vweird.f32 %v1033_v7 }
 0x59a   :  { %vm449_vm7 = vmor %vm447_vm6, %vm448_vm5 }
 0x59b   :  { %v444_v10 = vsub.f32 1.0, %v443_v9 }
 0x59d   :  { %v445_v12 = vmul.f32 %v1033_v7, %v444_v10  ;;  %v1215_v10 = vmov 6  }
 0x59e   :  { %990 = vset.pattern.permute.xlu2 %v1215_v10 }
 0x59f   :  { %v446_v14 = vadd.f32 %v1033_v7, %v445_v12 }
 0x5a1   :  { %v450_v16 = vsel %vm449_vm7, %v1033_v7, %v446_v14 }
 0x5a2   :  { %v455_v17 = vsel %vm452_vm8, %v454_v15, %v450_v16 }
 0x5a3   :  { %463 = vrot.lane.b32.xlu2 %v455_v17, %s1209_s5  ;;  %457 = vrot.lane.b32.xlu1 %v455_v17, %s1207_s0 }
 0x5a4   :  { %459 = vrot.lane.b32.xlu0 %v455_v17, %s1208_s2 }
 0x5ac   :  { %492 = vperm.xlu0 %989, %v1255_v3  }
 0x5fd   :  { %v464_v42 = vpop.permute.xlu2 %463 }
 0x615   :  { %v458_v20 = vpop.permute.xlu1 %457 }
 0x616   :  { %v460_v18 = vpop.permute.xlu0 %459  ;;  %v465_v22 = vmul.f32 %v458_v20, %v384_v41 }
 0x617   :  { %v461_v19 = vmul.f32 2.0, %v460_v18 }
 0x619   :  { %v935_v21 = vadd.f32 -1.0, %v461_v19 }
 0x61b   :  { %v466_v23 = vmul.f32 %v935_v21, %v455_v17 }
 0x61d   :  { %v467_v24 = vadd.f32 %v466_v23, %v465_v22 }
 0x61e   :  { %v493_v44 = vpop.permute.xlu0 %492 }
 0x61f   :  { %v936_v25 = vmul.f32 -2.0, %v467_v24  ;;  %v495_v45 = vmul.f32 %v1266_v5, %v493_v44 }
 0x621   :  { %v470_v26 = vmul.f32 1.442695, %v936_v25  ;;  %v496_v46 = vadd.f32 %v1269_v8, %v495_v45 }
 0x623   :  { %1034 = vpow2.f32 %v470_v26 }
 0x629   :  { %v1035_v28 = vpop.eup %1034 }
 0x62a   :  { %v472_v29 = vadd.f32 1.0, %v1035_v28 }
 0x62c   :  { %1036 = vrcp.f32 %v472_v29  ;;  %v484_v33 = vand.u32 2147483648, %v472_v29  ;;  %v482_v35 = vand.u32 2147483647, %v472_v29  ;;  %vm478_vm11 = vweird.f32 %v472_v29 }
 0x62e   :  { %v485_v37 = vor.u32 1.1754944e-38, %v484_v33  ;;  %vm483_vm13 = vcmp.eq.f32.partialorder %v482_v35, 8.507059e+37 }
 0x632   :  { %v1037_v30 = vpop.eup %1036 }
 0x633   :  { %v474_v31 = vmul.f32 %v1037_v30, %v472_v29  ;;  %vm479_vm10 = vweird.f32 %v1037_v30 }
 0x634   :  { %vm480_vm12 = vmor %vm478_vm11, %vm479_vm10 }
 0x635   :  { %v475_v32 = vsub.f32 1.0, %v474_v31 }
 0x637   :  { %v476_v34 = vmul.f32 %v1037_v30, %v475_v32  ;;  %v1216_v32 = vmov 7  }
 0x638   :  { %991 = vset.pattern.permute.xlu0 %v1216_v32 }
 0x639   :  { %v477_v36 = vadd.f32 %v1037_v30, %v476_v34 }
 0x63b   :  { %v481_v38 = vsel %vm480_vm12, %v1037_v30, %v477_v36 }
 0x63c   :  { %v486_v39 = vsel %vm483_vm13, %v485_v37, %v481_v38 }
 0x63d   :  { %v488_v40 = vmul.f32 2.0, %v486_v39 }
 0x63f   :  { %v937_v41 = vadd.f32 -1.0, %v488_v40 }
 0x641   :  { %v490_v43 = vmul.f32 %v937_v41, %v464_v42 }
 0x643   :  { %939 = vmatmul.msk.f32.vlgmr.msrb.gmra.mxu1 %vm77_vm9, %v490_v43 }
 0x6c0   :  { %v517_v47 = vpop.f32.mrf.mxu1 }
 0x6c1   :  { %v520_v48 = vadd.f32 %v517_v47, %v496_v46 }
 0x6c3   :  { %v940_v49 = vmul.f32 -1.442695, %v520_v48 }
 0x6c5   :  { %1038 = vpow2.f32 %v940_v49 }
 0x6cb   :  { %v1039_v50 = vpop.eup %1038 }
 0x6cc   :  { %v524_v51 = vadd.f32 1.0, %v1039_v50 }
 0x6ce   :  { %1040 = vrcp.f32 %v524_v51  ;;  %v536_v55 = vand.u32 2147483648, %v524_v51  ;;  %v534_v57 = vand.u32 2147483647, %v524_v51  ;;  %vm530_vm15 = vweird.f32 %v524_v51 }
 0x6d0   :  { %v537_v59 = vor.u32 1.1754944e-38, %v536_v55  ;;  %vm535_vm2 = vcmp.eq.f32.partialorder %v534_v57, 8.507059e+37 }
 0x6d4   :  { %v1041_v52 = vpop.eup %1040 }
 0x6d5   :  { %v526_v53 = vmul.f32 %v1041_v52, %v524_v51  ;;  %vm531_vm14 = vweird.f32 %v1041_v52 }
 0x6d6   :  { %vm532_vm1 = vmor %vm530_vm15, %vm531_vm14 }
 0x6d7   :  { %v527_v54 = vsub.f32 1.0, %v526_v53 }
 0x6d9   :  { %v528_v56 = vmul.f32 %v1041_v52, %v527_v54  ;;  %v995_v54 = vld [vmem:[#allocation7 + $0x50] ss:$0 sm:$0xff] }
 0x6db   :  { %v529_v58 = vadd.f32 %v1041_v52, %v528_v56 }
 0x6dd   :  { %v533_v60 = vsel %vm532_vm1, %v1041_v52, %v529_v58  ;;  %v994_v52 = vld [vmem:[#allocation7 + $0x48] ss:$0 sm:$0xff] }
 0x6de   :  { %v538_v61 = vsel %vm535_vm2, %v537_v59, %v533_v60 }
 0x6df   :  { %540 = vrot.lane.b32.xlu2 %v538_v61, %s1207_s0  ;;  %542 = vrot.lane.b32.xlu1 %v538_v61, %s1208_s2 }
 0x6e7   :  { %546 = vrot.lane.b32.xlu1 %v538_v61, %s1209_s5  ;;  %575 = vperm.xlu2 %990, %v1255_v3  }
 0x739   :  { %v541_v0 = vpop.permute.xlu2 %540 }
 0x73a   :  { %v548_v2 = vmul.f32 %v541_v0, %v467_v24 }
 0x741   :  { %v576_v27 = vpop.permute.xlu2 %575 }
 0x742   :  { %v578_v28 = vmul.f32 %v1266_v5, %v576_v27 }
 0x744   :  { %v579_v29 = vadd.f32 %v1269_v8, %v578_v28 }
 0x751   :  { %v543_v62 = vpop.permute.xlu1 %542 }
 0x752   :  { %v544_v63 = vmul.f32 2.0, %v543_v62 }
 0x754   :  { %v941_v1 = vadd.f32 -1.0, %v544_v63 }
 0x756   :  { %v549_v4 = vmul.f32 %v941_v1, %v538_v61 }
 0x758   :  { %v1310_v6 = vadd.f32 %v549_v4, %v548_v2 }
 0x759   :  { %v547_v25 = vpop.permute.xlu1 %546 }
 0x75a   :  { %v942_v7 = vmul.f32 -2.0, %v1310_v6 }
 0x75c   :  { %v553_v9 = vmul.f32 1.442695, %v942_v7 }
 0x75e   :  { %1042 = vpow2.f32 %v553_v9 }
 0x764   :  { %v1043_v11 = vpop.eup %1042 }
 0x765   :  { %v555_v12 = vadd.f32 1.0, %v1043_v11 }
 0x767   :  { %1044 = vrcp.f32 %v555_v12  ;;  %v567_v16 = vand.u32 2147483648, %v555_v12  ;;  %v565_v18 = vand.u32 2147483647, %v555_v12  ;;  %vm561_vm4 = vweird.f32 %v555_v12 }
 0x769   :  { %v568_v20 = vor.u32 1.1754944e-38, %v567_v16  ;;  %vm566_vm6 = vcmp.eq.f32.partialorder %v565_v18, 8.507059e+37 }
 0x76d   :  { %v1045_v13 = vpop.eup %1044 }
 0x76e   :  { %v557_v14 = vmul.f32 %v1045_v13, %v555_v12  ;;  %vm562_vm3 = vweird.f32 %v1045_v13 }
 0x76f   :  { %vm563_vm5 = vmor %vm561_vm4, %vm562_vm3 }
 0x770   :  { %v558_v15 = vsub.f32 1.0, %v557_v14 }
 0x772   :  { %v559_v17 = vmul.f32 %v1045_v13, %v558_v15 }
 0x774   :  { %v560_v19 = vadd.f32 %v1045_v13, %v559_v17 }
 0x776   :  { %v564_v21 = vsel %vm563_vm5, %v1045_v13, %v560_v19 }
 0x777   :  { %v569_v22 = vsel %vm566_vm6, %v568_v20, %v564_v21 }
 0x778   :  { %v571_v23 = vmul.f32 2.0, %v569_v22 }
 0x77a   :  { %v943_v24 = vadd.f32 -1.0, %v571_v23 }
 0x77c   :  { %v573_v26 = vmul.f32 %v943_v24, %v547_v25 }
 0x77e   :  { %945 = vmatmul.msk.f32.vlgmr.msrb.gmra.mxu2 %vm77_vm9, %v573_v26 }
 0x801   :  { %v600_v30 = vpop.f32.mrf.mxu2 }
 0x802   :  { %v603_v31 = vadd.f32 %v600_v30, %v579_v29 }
 0x804   :  { %v946_v33 = vmul.f32 -1.442695, %v603_v31 }
 0x806   :  { %1046 = vpow2.f32 %v946_v33 }
 0x80c   :  { %v1047_v34 = vpop.eup %1046 }
 0x80d   :  { %v607_v35 = vadd.f32 1.0, %v1047_v34 }
 0x80f   :  { %1048 = vrcp.f32 %v607_v35  ;;  %v619_v39 = vand.u32 2147483648, %v607_v35  ;;  %v617_v41 = vand.u32 2147483647, %v607_v35  ;;  %vm613_vm8 = vweird.f32 %v607_v35 }
 0x811   :  { %v620_v43 = vor.u32 1.1754944e-38, %v619_v39  ;;  %vm618_vm11 = vcmp.eq.f32.partialorder %v617_v41, 8.507059e+37 }
 0x815   :  { %v1049_v36 = vpop.eup %1048 }
 0x816   :  { %v609_v37 = vmul.f32 %v1049_v36, %v607_v35  ;;  %vm614_vm7 = vweird.f32 %v1049_v36 }
 0x817   :  { %vm615_vm10 = vmor %vm613_vm8, %vm614_vm7 }
 0x818   :  { %v610_v38 = vsub.f32 1.0, %v609_v37 }
 0x81a   :  { %v611_v40 = vmul.f32 %v1049_v36, %v610_v38 }
 0x81c   :  { %v612_v42 = vadd.f32 %v1049_v36, %v611_v40 }
 0x81e   :  { %v616_v44 = vsel %vm615_vm10, %v1049_v36, %v612_v42 }
 0x81f   :  { %v621_v45 = vsel %vm618_vm11, %v620_v43, %v616_v44 }
 0x820   :  { %629 = vrot.lane.b32.xlu2 %v621_v45, %s1209_s5  ;;  %623 = vrot.lane.b32.xlu1 %v621_v45, %s1207_s0 }
 0x821   :  { %625 = vrot.lane.b32.xlu0 %v621_v45, %s1208_s2 }
 0x829   :  { %658 = vperm.xlu0 %991, %v1255_v3  }
 0x87a   :  { %v630_v25 = vpop.permute.xlu2 %629 }
 0x892   :  { %v624_v48 = vpop.permute.xlu1 %623 }
 0x893   :  { %v626_v46 = vpop.permute.xlu0 %625  ;;  %v631_v50 = vmul.f32 %v624_v48, %v1310_v6 }
 0x894   :  { %v627_v47 = vmul.f32 2.0, %v626_v46 }
 0x896   :  { %v947_v49 = vadd.f32 -1.0, %v627_v47 }
 0x898   :  { %v632_v51 = vmul.f32 %v947_v49, %v621_v45 }
 0x89a   :  { %v1322_v53 = vadd.f32 %v632_v51, %v631_v50  ;;  %v797_v51 = vlaneseq }
 0x89b   :  { %v659_v55 = vpop.permute.xlu0 %658 }
 0x89c   :  { %v948_v56 = vmul.f32 -2.0, %v1322_v53  ;;  %v741_v57 = vmul.f32 %v994_v52, %v659_v55  ;;  %v661_v36 = vmul.f32 %v1266_v5, %v659_v55  ;;  %v1331_v55 = vand.u32 127, %v797_v51  ;;  %v870_v51 = vld [vmem:[#allocation5] sm:$0xff] }
 0x89e   :  { %v636_v58 = vmul.f32 1.442695, %v948_v56  ;;  %v743_v59 = vadd.f32 %v995_v54, %v741_v57  ;;  %v662_v39 = vadd.f32 %v1269_v8, %v661_v36  ;;  %vm799_vm10 = vcmp.lt.s32.totalorder %v1331_v55, 12 }
 0x8a0   :  { %1050 = vpow2.f32 %v636_v58  ;;  %v956_v60 = vmul.f32 -1.442695, %v743_v59 }
 0x8a2   :  { %1052 = vpow2.f32 %v956_v60 }
 0x8a6   :  { %v1051_v3 = vpop.eup %1050 }
 0x8a7   :  { %v638_v61 = vadd.f32 1.0, %v1051_v3 }
 0x8a8   :  { %v1053_v62 = vpop.eup %1052 }
 0x8a9   :  { %1054 = vrcp.f32 %v638_v61  ;;  %v747_v63 = vadd.f32 1.0, %v1053_v62  ;;  %v648_v7 = vand.u32 2147483647, %v638_v61  ;;  %v650_v10 = vand.u32 2147483648, %v638_v61 }
 0x8aa   :  { %vm644_vm15 = vweird.f32 %v638_v61 }
 0x8ab   :  { %1056 = vrcp.f32 %v747_v63  ;;  %vm753_vm12 = vweird.f32 %v747_v63  ;;  %v759_v9 = vand.u32 2147483648, %v747_v63  ;;  %v757_v12 = vand.u32 2147483647, %v747_v63 }
 0x8ac   :  { %v651_v17 = vor.u32 1.1754944e-38, %v650_v10  ;;  %vm649_vm4 = vcmp.eq.f32.partialorder %v648_v7, 8.507059e+37 }
 0x8ad   :  { %v760_v16 = vor.u32 1.1754944e-38, %v759_v9  ;;  %vm758_vm3 = vcmp.eq.f32.partialorder %v757_v12, 8.507059e+37 }
 0x8af   :  { %v1055_v0 = vpop.eup %1054 }
 0x8b0   :  { %v640_v1 = vmul.f32 %v1055_v0, %v638_v61  ;;  %vm645_vm13 = vweird.f32 %v1055_v0 }
 0x8b1   :  { %v1057_v2 = vpop.eup %1056  ;;  %vm646_vm1 = vmor %vm644_vm15, %vm645_vm13 }
 0x8b2   :  { %v749_v4 = vmul.f32 %v1057_v2, %v747_v63  ;;  %v641_v6 = vsub.f32 1.0, %v640_v1  ;;  %vm754_vm14 = vweird.f32 %v1057_v2 }
 0x8b3   :  { %vm755_vm2 = vmor %vm753_vm12, %vm754_vm14 }
 0x8b4   :  { %v750_v11 = vsub.f32 1.0, %v749_v4  ;;  %v642_v13 = vmul.f32 %v1055_v0, %v641_v6 }
 0x8b6   :  { %v751_v14 = vmul.f32 %v1057_v2, %v750_v11  ;;  %v643_v15 = vadd.f32 %v1055_v0, %v642_v13 }
 0x8b8   :  { %v752_v18 = vadd.f32 %v1057_v2, %v751_v14  ;;  %v647_v19 = vsel %vm646_vm1, %v1055_v0, %v643_v15 }
 0x8b9   :  { %v652_v20 = vsel %vm649_vm4, %v651_v17, %v647_v19  ;;  %v806_v19 = vld [vmem:[#allocation7 + $0x18] sm:$0xff] }
 0x8ba   :  { %v756_v21 = vsel %vm755_vm2, %v1057_v2, %v752_v18  ;;  %v654_v22 = vmul.f32 2.0, %v652_v20  ;;  %v807_v18 = vld [vmem:[#allocation7 + $0x20] sm:$0xff]  ;;  %v805_v20 = vld [vmem:[#allocation7 + $0x10] sm:$0xff] }
 0x8bb   :  { %v761_v23 = vsel %vm758_vm3, %v760_v16, %v756_v21  ;;  %830 = vmatpush.msra.mxu0 %v807_v18  ;;  %v810_v21 = vld [vmem:[#allocation7 + $0x30] sm:$0xf] }
 0x8bc   :  { %765 = vrot.lane.b32.xlu1 %v761_v23, %s1208_s2  ;;  %v949_v24 = vadd.f32 -1.0, %v654_v22  ;;  %763 = vrot.lane.b32.xlu2 %v761_v23, %s1207_s0 }
 0x8bd   :  { %831 = vmatpush.msra.mxu0 %v806_v19  ;;  %961 = vmatpush.msk.msra.mxu1 %vm81_vm0, %v810_v21  ;;  %vm813_vm0 = vcmask 195584  }
 0x8be   :  { %v656_v26 = vmul.f32 %v949_v24, %v630_v25 }
 0x8bf   :  { %832 = vmatpush.msra.mxu0 %v805_v20 }
 0x8c0   :  { %951 = vmatmul.msk.f32.vlgmr.msrb.gmra.mxu3 %vm77_vm9, %v656_v26 }
 0x8c4   :  { %769 = vrot.lane.b32.xlu2 %v761_v23, %s1209_s5 }
 0x916   :  { %v764_v28 = vpop.permute.xlu2 %763 }
 0x917   :  { %v771_v31 = vmul.f32 0.0, %v764_v28 }
 0x91e   :  { %v770_v59 = vpop.permute.xlu2 %769 }
 0x92e   :  { %v766_v27 = vpop.permute.xlu1 %765 }
 0x92f   :  { %v767_v29 = vmul.f32 2.0, %v766_v27 }
 0x931   :  { %v957_v30 = vadd.f32 -1.0, %v767_v29 }
 0x933   :  { %v772_v32 = vmul.f32 %v957_v30, %v761_v23 }
 0x935   :  { %v773_v33 = vadd.f32 %v772_v32, %v771_v31 }
 0x937   :  { %v958_v34 = vmul.f32 -2.0, %v773_v33 }
 0x939   :  { %v776_v35 = vmul.f32 1.442695, %v958_v34 }
 0x93b   :  { %1058 = vpow2.f32 %v776_v35 }
 0x941   :  { %v1059_v37 = vpop.eup %1058 }
 0x942   :  { %v778_v38 = vadd.f32 1.0, %v1059_v37 }
 0x943   :  { %v683_v40 = vpop.f32.mrf.mxu3 }
 0x944   :  { %1060 = vrcp.f32 %v778_v38  ;;  %v686_v41 = vadd.f32 %v683_v40, %v662_v39  ;;  %v790_v47 = vand.u32 2147483648, %v778_v38  ;;  %v788_v50 = vand.u32 2147483647, %v778_v38  ;;  %v809_v40 = vld [vmem:[#allocation7 + $0x28] sm:$0xff] }
 0x945   :  { %vm784_vm6 = vweird.f32 %v778_v38  ;;  %860 = vmatpush.msra.mxu1 %v809_v40 }
 0x946   :  { %v952_v42 = vmul.f32 -1.442695, %v686_v41  ;;  %v791_v8 = vor.u32 1.1754944e-38, %v790_v47  ;;  %vm789_vm8 = vcmp.eq.f32.partialorder %v788_v50, 8.507059e+37  ;;  %v996_v41 = vld [vmem:[#allocation7 + $0x58] ss:$0 sm:$0xff] }
 0x948   :  { %1062 = vpow2.f32 %v952_v42 }
 0x94a   :  { %v1061_v43 = vpop.eup %1060 }
 0x94b   :  { %v780_v44 = vmul.f32 %v1061_v43, %v778_v38  ;;  %vm785_vm5 = vweird.f32 %v1061_v43 }
 0x94c   :  { %vm786_vm7 = vmor %vm784_vm6, %vm785_vm5 }
 0x94d   :  { %v781_v45 = vsub.f32 1.0, %v780_v44 }
 0x94e   :  { %v1063_v46 = vpop.eup %1062 }
 0x94f   :  { %v690_v48 = vadd.f32 1.0, %v1063_v46  ;;  %v782_v49 = vmul.f32 %v1061_v43, %v781_v45  ;;  %v997_v45 = vld [vmem:[#allocation7 + $0x60] ss:$0 sm:$0xff] }
 0x951   :  { %1064 = vrcp.f32 %v690_v48  ;;  %v783_v5 = vadd.f32 %v1061_v43, %v782_v49  ;;  %v702_v63 = vand.u32 2147483648, %v690_v48  ;;  %v700_v1 = vand.u32 2147483647, %v690_v48 }
 0x952   :  { %vm696_vm12 = vweird.f32 %v690_v48 }
 0x953   :  { %v787_v52 = vsel %vm786_vm7, %v1061_v43, %v783_v5  ;;  %v703_v4 = vor.u32 1.1754944e-38, %v702_v63  ;;  %vm701_vm14 = vcmp.eq.f32.partialorder %v700_v1, 8.507059e+37 }
 0x954   :  { %v792_v54 = vsel %vm789_vm8, %v791_v8, %v787_v52 }
 0x955   :  { %v794_v56 = vmul.f32 2.0, %v792_v54 }
 0x957   :  { %v1065_v57 = vpop.eup %1064  ;;  %v959_v58 = vadd.f32 -1.0, %v794_v56 }
 0x958   :  { %v692_v60 = vmul.f32 %v1065_v57, %v690_v48  ;;  %vm697_vm11 = vweird.f32 %v1065_v57 }
 0x959   :  { %v796_v3 = vmul.f32 %v959_v58, %v770_v59  ;;  %vm698_vm13 = vmor %vm696_vm12, %vm697_vm11 }
 0x95a   :  { %v693_v61 = vsub.f32 1.0, %v692_v60 }
 0x95b   :  { %v801_v62 = vsel %vm799_vm10, %v796_v3, 0.0 }
 0x95c   :  { %802 = vrot.lane.b32.xlu2 %v801_v62, %s1217_s6  ;;  %v694_v0 = vmul.f32 %v1065_v57, %v693_v61 }
 0x95e   :  { %v695_v2 = vadd.f32 %v1065_v57, %v694_v0 }
 0x960   :  { %v699_v6 = vsel %vm698_vm13, %v1065_v57, %v695_v2 }
 0x961   :  { %v704_v7 = vsel %vm701_vm14, %v703_v4, %v699_v6 }
 0x962   :  { %706 = vrot.lane.b32.xlu0 %v704_v7, %s1207_s0  ;;  %708 = vrot.lane.b32.xlu1 %v704_v7, %s1208_s2 }
 0x96a   :  { %712 = vrot.lane.b32.xlu1 %v704_v7, %s1209_s5 }
 0x9b6   :  { %v803_v37 = vpop.permute.xlu2 %802 }
 0x9d4   :  { %v709_v9 = vpop.permute.xlu1 %708  ;;  %v707_v11 = vpop.permute.xlu0 %706 }
 0x9d5   :  { %v710_v10 = vmul.f32 2.0, %v709_v9  ;;  %v714_v13 = vmul.f32 %v707_v11, %v1322_v53 }
 0x9d7   :  { %v953_v12 = vadd.f32 -1.0, %v710_v10 }
 0x9d9   :  { %v715_v14 = vmul.f32 %v953_v12, %v704_v7 }
 0x9db   :  { %v716_v15 = vadd.f32 %v715_v14, %v714_v13 }
 0x9dc   :  { %v713_v35 = vpop.permute.xlu1 %712 }
 0x9dd   :  { %v954_v16 = vmul.f32 -2.0, %v716_v15 }
 0x9df   :  { %v719_v17 = vmul.f32 1.442695, %v954_v16 }
 0x9e1   :  { %1066 = vpow2.f32 %v719_v17 }
 0x9e7   :  { %v1067_v22 = vpop.eup %1066 }
 0x9e8   :  { %v721_v23 = vadd.f32 1.0, %v1067_v22 }
 0x9ea   :  { %1068 = vrcp.f32 %v721_v23  ;;  %v733_v26 = vand.u32 2147483648, %v721_v23  ;;  %v731_v28 = vand.u32 2147483647, %v721_v23  ;;  %vm727_vm1 = vweird.f32 %v721_v23 }
 0x9ec   :  { %v734_v30 = vor.u32 1.1754944e-38, %v733_v26  ;;  %vm732_vm3 = vcmp.eq.f32.partialorder %v731_v28, 8.507059e+37 }
 0x9f0   :  { %v1069_v24 = vpop.eup %1068 }
 0x9f1   :  { %v723_v25 = vmul.f32 %v1069_v24, %v721_v23  ;;  %vm728_vm15 = vweird.f32 %v1069_v24 }
 0x9f2   :  { %vm729_vm2 = vmor %vm727_vm1, %vm728_vm15 }
 0x9f3   :  { %v724_v53 = vsub.f32 1.0, %v723_v25 }
 0x9f5   :  { %v725_v27 = vmul.f32 %v1069_v24, %v724_v53 }
 0x9f7   :  { %v726_v29 = vadd.f32 %v1069_v24, %v725_v27 }
 0x9f9   :  { %v730_v31 = vsel %vm729_vm2, %v1069_v24, %v726_v29 }
 0x9fa   :  { %v735_v32 = vsel %vm732_vm3, %v734_v30, %v730_v31 }
 0x9fb   :  { %v737_v33 = vmul.f32 2.0, %v735_v32 }
 0x9fd   :  { %v955_v34 = vadd.f32 -1.0, %v737_v33 }
 0x9ff   :  { %v739_v36 = vmul.f32 %v955_v34, %v713_v35 }
 0xa01   :  { %v800_v38 = vsel %vm799_vm10, %v739_v36, 0.0 }
 0xa02   :  { %v804_v39 = vadd.f32 %v803_v37, %v800_v38 }
 0xa04   :  { %960 = vmatmul.msk.f32.vlgmr.msra.gmra.mxu0 %vm813_vm0, %v804_v39 }
 0xa81   :  { %v834_v42 = vpop.f32.mrf.mxu0 }
 0xa82   :  { %v835_v43 = vadd.f32 %v996_v41, %v834_v42 }
 0xa84   :  { %v837_v44 = vmax.f32 %v835_v43, 0.0 }
 0xa86   :  { %962 = vmatmul.msk.f32.vlgmr.msra.gmra.mxu1 %vm77_vm9, %v837_v44 }
 0xb03   :  { %v862_v46 = vpop.f32.mrf.mxu1 }
 0xb04   :  { %v863_v47 = vadd.f32 %v997_v45, %v862_v46 }
 0xb06   :  { %874 = vst.msk [vmem:[#allocation9] sm:$0xff] %vm813_vm0, %v863_v47  ;;  %865 = vrot.lane.b32.xlu0 %v863_v47, %s1218_s7 }
 0xb07   :  { %896 = dma.vmem_to_hbm [thread:$0]  %s892_s9, 128, %s894_s12, [#allocation10]  }
 0xb78   :  { %v866_v48 = vpop.permute.xlu0 %865 }
 0xb79   :  { %v867_v49 = vmul.f32 0.5, %v866_v48 }
 0xb7b   :  { %v868_v50 = vmul.f32 1.442695, %v867_v49 }
 0xb7d   :  { %1070 = vpow2.f32 %v868_v50 }
 0xb83   :  { %v1071_v5 = vpop.eup %1070 }
 0xb84   :  { %v871_v8 = vmul.f32 %v1071_v5, %v870_v51 }
 0xb86   :  { %v872_v52 = vadd.f32 %v871_v8, %v863_v47 }
 0xb88   :  { %873 = vst.msk [vmem:[#allocation8] sm:$0xff] %vm77_vm9, %v872_v52 }
 0xb89   :  { %885 = dma.vmem_to_hbm [thread:$0]  %s881_s14, 128, %s883_s17, [#allocation4]  }
 0xb8a   :  { %1196 = dma.done.wait [#allocation4], 128  }
 0xb8b   :  { %1197 = vsyncadd [#allocation4], 4294967168 }
 0xb8c   :  { %1198 = dma.done.wait [#allocation10], 128  }
 0xb8d   :  { %1199 = vsyncadd [#allocation10], 4294967168 }
 0xb8e   :  { %905 = vsyncpa [#allocation3], 1 }
 0xb8f   :  { %906 = vsyncpa [#allocation6], 1 }
 0xb90   :  { %907 = vsyncpa [#allocation4], 1 }
 0xb91   :  { %908 = vsyncpa [#allocation10], 1 }

</bundles_post_ra>
